<compile_context>
chip_gen: v6e
topology: v6e:2x2x1
jax: 0.10.0
libtpu: 0.0.40
codegen_flags: <defaults>
</compile_context>

<pallas_src>
import jax
import jax.numpy as jnp
from jax.experimental import pallas as pl
from jax.experimental.pallas import tpu as pltpu

EPS_RMS = 1e-6          # RMSNorm eps
EPS_LN = 1e-5           # nn.LayerNorm default eps

_VMEM_LIMIT = None


def _vmem_limit():
    """Generation-aware VMEM limit (leave ~15% headroom for Mosaic)."""
    global _VMEM_LIMIT
    if _VMEM_LIMIT is None:
        try:
            cap = int(pltpu.get_tpu_info().vmem_capacity_bytes)
            _VMEM_LIMIT = min(max(int(0.85 * cap), 32 * 1024 * 1024),
                              128 * 1024 * 1024)
        except Exception:
            _VMEM_LIMIT = 64 * 1024 * 1024
    return _VMEM_LIMIT


# ----------------------------- small helpers --------------------------------

def _silu(x):
    return x * jax.nn.sigmoid(x)


def _rmsnorm(x, w):
    ms = jnp.mean(x * x, axis=-1, keepdims=True)
    return x * jax.lax.rsqrt(ms + EPS_RMS) * w


def _round_up(x, m):
    return (x + m - 1) // m * m


def _pick_tile(n):
    for c in (512, 256, 128):
        if n % c == 0:
            return c
    raise ValueError(f"dim {n} must be a multiple of 128")


def _choose_tm(bl, tm_req=512):
    tm = min(tm_req, _round_up(bl, 16))
    # Keep >= 2 row tiles where possible so v7x's two TensorCores (sharded via
    # the "parallel" row axis) both get work; cost on 1-TC chips is small.
    half = _round_up(max((bl + 1) // 2, 16), 16)
    return max(16, min(tm, half))


def _pack_pairs(a, b, tile):
    """Interleave column tiles of a and b so grid tile k holds [a_k | b_k]."""
    din, f = a.shape
    nt = f // tile
    return jnp.concatenate(
        [a.reshape(din, nt, tile), b.reshape(din, nt, tile)], axis=-1
    ).reshape(din, 2 * f)


# ------------------------------ Pallas kernels -------------------------------
# All matmul weights arrive pre-transposed to (in, out) and pre-cast to bf16;
# MXU matmuls accumulate in f32 (preferred_element_type). Norms / SiLU /
# residuals stay in f32.

def sconv_in_kernel(x_ref, wn_ref, wzz_ref, bzz_ref, z_ref, xn_sc):
    """z = fc_z(RMSNorm(x)) * silu(fc_z_act(RMSNorm(x))), fused gate/value.

    Grid = (row_tiles, col_tiles); the normalized LHS is computed once per row
    tile (cached bf16 scratch) and reused for every column tile."""
    j = pl.program_id(1)

    @pl.when(j == 0)
    def _():
        xn_sc[...] = _rmsnorm(x_ref[...], wn_ref[...]).astype(jnp.bfloat16)

    tn = z_ref.shape[-1]
    zz = jnp.dot(xn_sc[...], wzz_ref[...],
                 preferred_element_type=jnp.float32) + bzz_ref[...]
    z_ref[...] = zz[:, :tn] * _silu(zz[:, tn:])


def sconv_mid_kernel(h_ref, x_ref, wns_ref, wnh_ref,
                     wy_ref, by_ref, wya_ref, bya_ref, o_ref):
    """x_mid = fc_y(RMSNorm_h(h)) * silu(fc_y_act(RMSNorm_sconv(x))) + x.

    Row-tiled only, so the DxD fc_y / fc_y_act weights are resident for a
    single pass instead of the whole FFN reduction loop.
    (fc_y and fc_y_act take different inputs -> two separate dots.)"""
    x = x_ref[...]
    xn = _rmsnorm(x, wns_ref[...]).astype(jnp.bfloat16)          # norm_sconv(x)
    hn = _rmsnorm(h_ref[...].astype(jnp.float32),
                  wnh_ref[...]).astype(jnp.bfloat16)             # sconv.norm(h)
    y = ((jnp.dot(hn, wy_ref[...], preferred_element_type=jnp.float32)
          + by_ref[...])
         * _silu(jnp.dot(xn, wya_ref[...], preferred_element_type=jnp.float32)
                 + bya_ref[...]))
    o_ref[...] = y + x


def ffn_kernel(xmid_ref, wnf_ref, w12_ref, b12_ref, w3_ref, b3_ref,
               o_ref, xnf_sc):
    """out = FFNSwiGLU(RMSNorm_ffn(x_mid)) + x_mid, ff axis reduced in-place.

    Grid = (row_tiles, ff_tiles). The output block is VMEM-resident across the
    ff axis: x_mid is written into o_ref at k==0 and fc_out partials are
    accumulated directly into it (no separate f32 scratches)."""
    k = pl.program_id(1)

    @pl.when(k == 0)
    def _():
        xm = xmid_ref[...]
        xnf_sc[...] = _rmsnorm(xm, wnf_ref[...]).astype(jnp.bfloat16)
        o_ref[...] = xm                               # residual; accumulate on top

    tf = w3_ref.shape[0]
    z12 = jnp.dot(xnf_sc[...], w12_ref[...],
                  preferred_element_type=jnp.float32) + b12_ref[...]
    hh = (z12[:, :tf] * _silu(z12[:, tf:])).astype(jnp.bfloat16)
    o_ref[...] += jnp.dot(hh, w3_ref[...], preferred_element_type=jnp.float32)

    @pl.when(k == pl.num_programs(1) - 1)
    def _():
        o_ref[...] += b3_ref[...]


def head_kernel(x_ref, lnw_ref, lnb_ref, wo_ref, bo_ref, o_ref, xn_sc):
    """logits = token_out(LayerNorm(x)); LayerNorm computed once per row tile
    (cached bf16), vocab tiles on the inner 'arbitrary' axis."""
    v = pl.program_id(1)

    @pl.when(v == 0)
    def _():
        x = x_ref[...]
        mu = jnp.mean(x, axis=-1, keepdims=True)
        var = jnp.mean((x - mu) ** 2, axis=-1, keepdims=True)
        xn = (x - mu) * jax.lax.rsqrt(var + EPS_LN) * lnw_ref[...] + lnb_ref[...]
        xn_sc[...] = xn.astype(jnp.bfloat16)

    o_ref[...] = jnp.dot(xn_sc[...], wo_ref[...],
                         preferred_element_type=jnp.float32) + bo_ref[...]


# ------------------------------ pallas_call glue -----------------------------

def sconv_in(x2, wn, wzz_b, bzz, tm, tn):
    R, D = x2.shape
    return pl.pallas_call(
        sconv_in_kernel,
        out_shape=jax.ShapeDtypeStruct((R, D), jnp.float32),
        grid=(R // tm, D // tn),
        in_specs=[
            pl.BlockSpec((tm, D), lambda i, j: (i, 0)),       # x (resident over j)
            pl.BlockSpec((1, D), lambda i, j: (0, 0)),        # w_norm_sconv
            pl.BlockSpec((D, 2 * tn), lambda i, j: (0, j)),   # [wz|wza] tile (bf16)
            pl.BlockSpec((1, 2 * tn), lambda i, j: (0, j)),   # [bz|bza] tile
        ],
        out_specs=pl.BlockSpec((tm, tn), lambda i, j: (i, j)),
        scratch_shapes=[pltpu.VMEM((tm, D), jnp.bfloat16)],   # cached RMSNorm(x)
        compiler_params=pltpu.CompilerParams(
            dimension_semantics=("parallel", "arbitrary"),
            vmem_limit_bytes=_vmem_limit()),
    )(x2, wn, wzz_b, bzz)


def sconv_mid(h_bf, x2, wns, wnh, wy_b, by, wya_b, bya, tm):
    R, D = x2.shape
    row = lambda i: (i, 0)
    const = lambda i: (0, 0)
    # TODO(synk): at very large D (>= ~4k) on v7x, column-tile wy/wya here too.
    return pl.pallas_call(
        sconv_mid_kernel,
        out_shape=jax.ShapeDtypeStruct((R, D), jnp.float32),
        grid=(R // tm,),
        in_specs=[
            pl.BlockSpec((tm, D), row),     # h (bf16)
            pl.BlockSpec((tm, D), row),     # x residual (f32)
            pl.BlockSpec((1, D), const),    # w_norm_sconv
            pl.BlockSpec((1, D), const),    # w_norm_h
            pl.BlockSpec((D, D), const),    # wy (bf16)
            pl.BlockSpec((1, D), const),    # by
            pl.BlockSpec((D, D), const),    # wya (bf16)
            pl.BlockSpec((1, D), const),    # bya
        ],
        out_specs=pl.BlockSpec((tm, D), row),
        compiler_params=pltpu.CompilerParams(
            dimension_semantics=("parallel",),
            vmem_limit_bytes=_vmem_limit()),
    )(h_bf, x2, wns, wnh, wy_b, by, wya_b, bya)


def ffn(xmid, wnf, w12_b, b12, w3_b, b3, tm, tf):
    R, D = xmid.shape
    F = w3_b.shape[0]
    return pl.pallas_call(
        ffn_kernel,
        out_shape=jax.ShapeDtypeStruct((R, D), jnp.float32),
        grid=(R // tm, F // tf),
        in_specs=[
            pl.BlockSpec((tm, D), lambda i, k: (i, 0)),        # x_mid (resident)
            pl.BlockSpec((1, D), lambda i, k: (0, 0)),         # w_norm_ffn
            pl.BlockSpec((D, 2 * tf), lambda i, k: (0, k)),    # [w1|w2] tile (bf16)
            pl.BlockSpec((1, 2 * tf), lambda i, k: (0, k)),    # [b1|b2] tile
            pl.BlockSpec((tf, D), lambda i, k: (k, 0)),        # w3 tile (bf16)
            pl.BlockSpec((1, D), lambda i, k: (0, 0)),         # b3
        ],
        out_specs=pl.BlockSpec((tm, D), lambda i, k: (i, 0)),  # accumulator
        scratch_shapes=[pltpu.VMEM((tm, D), jnp.bfloat16)],    # RMSNorm_ffn(x_mid)
        compiler_params=pltpu.CompilerParams(
            dimension_semantics=("parallel", "arbitrary"),
            vmem_limit_bytes=_vmem_limit()),
    )(xmid, wnf, w12_b, b12, w3_b, b3)


def head(x2, lnw, lnb, wo_b, bo, tm, tv):
    R, D = x2.shape
    V = wo_b.shape[1]
    return pl.pallas_call(
        head_kernel,
        out_shape=jax.ShapeDtypeStruct((R, V), jnp.float32),
        grid=(R // tm, V // tv),
        in_specs=[
            pl.BlockSpec((tm, D), lambda i, v: (i, 0)),
            pl.BlockSpec((1, D), lambda i, v: (0, 0)),
            pl.BlockSpec((1, D), lambda i, v: (0, 0)),
            pl.BlockSpec((D, tv), lambda i, v: (0, v)),
            pl.BlockSpec((1, tv), lambda i, v: (0, v)),
        ],
        out_specs=pl.BlockSpec((tm, tv), lambda i, v: (i, v)),
        scratch_shapes=[pltpu.VMEM((tm, D), jnp.bfloat16)],    # cached LayerNorm(x)
        compiler_params=pltpu.CompilerParams(
            dimension_semantics=("parallel", "arbitrary"),
            vmem_limit_bytes=_vmem_limit()),
    )(x2, lnw, lnb, wo_b, bo)


# ------------------------------ parameters -----------------------------------

def init_params(key, depth, dim, dim_ff, vocab):
    ks = iter(jax.random.split(key, 10 * depth + 4))

    def lin(k, din, dout, std):
        # stored (in, out), i.e. transposed vs nn.Linear's (out, in)
        return std * jax.random.normal(k, (din, dout), jnp.float32)

    xavier_std = 0.01 * (2.0 / (2.0 * dim)) ** 0.5   # xavier_normal_, gain=0.01

    blocks = []
    for _ in range(depth):
        blk = dict(
            wz=lin(next(ks), dim, dim, xavier_std), bz=jnp.zeros((1, dim), jnp.float32),
            wza=lin(next(ks), dim, dim, xavier_std), bza=jnp.zeros((1, dim), jnp.float32),
            wy=lin(next(ks), dim, dim, xavier_std), by=jnp.zeros((1, dim), jnp.float32),
            wya=lin(next(ks), dim, dim, xavier_std), bya=jnp.zeros((1, dim), jnp.float32),
            phazor_angle_scale=(0.001 ** jnp.linspace(0.0, 1.0, dim)).astype(jnp.float32),
            last_conv_init=((jax.random.normal(next(ks), (dim,), jnp.float32)
                             + 1j * jax.random.normal(next(ks), (dim,), jnp.float32))
                            / jnp.sqrt(2.0)).astype(jnp.complex64),
            w_norm_sconv=jnp.ones((1, dim), jnp.float32),   # RMSNorm before sconv
            w_norm_h=jnp.ones((1, dim), jnp.float32),       # RMSNorm inside SConvLayer
            w_norm_ffn=jnp.ones((1, dim), jnp.float32),     # RMSNorm before FFN
            w1=lin(next(ks), dim, dim_ff, (1.0 / dim) ** 0.5),
            b1=jnp.zeros((1, dim_ff), jnp.float32),
            w2=lin(next(ks), dim, dim_ff, (1.0 / dim) ** 0.5),
            b2=jnp.zeros((1, dim_ff), jnp.float32),
            w3=lin(next(ks), dim_ff, dim, (1.0 / dim_ff) ** 0.5),
            b3=jnp.zeros((1, dim), jnp.float32),
        )
        blocks.append(blk)

    return dict(
        emb=jax.random.normal(next(ks), (vocab, dim), jnp.float32),
        ln_w=jnp.ones((1, dim), jnp.float32),
        ln_b=jnp.zeros((1, dim), jnp.float32),
        wo=lin(next(ks), dim, vocab, (1.0 / dim) ** 0.5),
        bo=jnp.zeros((1, vocab), jnp.float32),
        blocks=blocks,
    )


def prepare_params(params):
    """One-time (outside jit) bf16 cast + gate/value weight fusion."""
    dim = params["emb"].shape[1]
    dim_ff = params["blocks"][0]["w1"].shape[1]
    tn = _pick_tile(dim)
    tf = _pick_tile(dim_ff)
    blocks = []
    for blk in params["blocks"]:
        blocks.append(dict(
            wzz_b=_pack_pairs(blk["wz"], blk["wza"], tn).astype(jnp.bfloat16),
            bzz=_pack_pairs(blk["bz"], blk["bza"], tn),
            wy_b=blk["wy"].astype(jnp.bfloat16), by=blk["by"],
            wya_b=blk["wya"].astype(jnp.bfloat16), bya=blk["bya"],
            w12_b=_pack_pairs(blk["w1"], blk["w2"], tf).astype(jnp.bfloat16),
            b12=_pack_pairs(blk["b1"], blk["b2"], tf),
            w3_b=blk["w3"].astype(jnp.bfloat16), b3=blk["b3"],
            w_norm_sconv=blk["w_norm_sconv"],
            w_norm_h=blk["w_norm_h"],
            w_norm_ffn=blk["w_norm_ffn"],
            phazor_angle_scale=blk["phazor_angle_scale"],
            last_conv_init=blk["last_conv_init"],
        ))
    return dict(
        emb=params["emb"],
        ln_w=params["ln_w"], ln_b=params["ln_b"],
        wo_b=params["wo"].astype(jnp.bfloat16), bo=params["bo"],
        blocks=blocks,
    )


# ------------------------------ forward pass ---------------------------------

def sconv_lti_forward(tokens, p, tm_req=512):
    B, L = tokens.shape
    dim = p["emb"].shape[1]
    vocab = p["wo_b"].shape[1]
    dim_ff = p["blocks"][0]["w3_b"].shape[0]
    if dim % 128 or dim_ff % 128 or vocab % 128:
        raise ValueError("dim / dim_ff / vocab must be multiples of 128 (lane-dense)")
    BL = B * L

    tm = _choose_tm(BL, tm_req)
    BLp = _round_up(BL, tm)                  # pad rows; no silently dropped tail
    tn = _pick_tile(dim)
    tf = _pick_tile(dim_ff)
    tv = _pick_tile(vocab)

    # token_in: nn.Embedding(max_norm=1) -> gather + renorm (plain JAX glue)
    x = p["emb"][tokens]                                            # (B, L, D)
    nrm = jnp.sqrt(jnp.sum(x * x, axis=-1, keepdims=True))
    x = x * jnp.where(nrm > 1.0, 1.0 / (nrm + 1e-7), 1.0)
    x2 = x.reshape(BL, dim).astype(jnp.float32)
    x2 = jnp.pad(x2, ((0, BLp - BL), (0, 0)))                       # (BLp, D)

    for blk in p["blocks"]:
        # --- SConv pre: z = fc_z(norm(x)) * silu(fc_z_act(norm(x)))  (Pallas) ---
        z = sconv_in(x2, blk["w_norm_sconv"], blk["wzz_b"], blk["bzz"], tm, tn)

        # --- phazor FFT long-convolution (complex), plain JAX -------------------
        # TODO(synk): complex FFT has no Pallas TPU primitive; done with jnp.fft.
        # rfft + first-L bins is exactly equivalent to the reference's full fft +
        # narrow, because the ifft is over the batch axis (dim=0), as in PyTorch.
        ln_phazor = blk["phazor_angle_scale"].astype(jnp.complex64) * 1j - 1e-5
        l_idx = jnp.arange(L, dtype=jnp.float32)
        phazor_prog = jnp.exp(l_idx[:, None] * ln_phazor[None, :])          # (L, D)
        ppf = jnp.fft.fft(phazor_prog, n=2 * L, axis=0)[:L]                 # (L, D)
        z3 = z[:BL].reshape(B, L, dim)                                      # real f32
        zf = jnp.fft.rfft(z3, n=2 * L, axis=1)[:, :L, :]                    # (B, L, D)
        h_inner = jnp.fft.ifft(zf * ppf[None], axis=0)                      # ifft over batch
        last_conv = jnp.broadcast_to(blk["last_conv_init"][None, :], (B, dim))
        h_cross = (last_conv[:, None, :] * phazor_prog[None, :, :]
                   * jnp.exp(ln_phazor)[None, None, :])
        h_real = jnp.real(h_inner + h_cross).reshape(BL, dim).astype(jnp.bfloat16)
        h_real = jnp.pad(h_real, ((0, BLp - BL), (0, 0)))

        # --- x_mid = fc_y(norm_h(h)) * silu(fc_y_act(norm_sconv(x))) + x (Pallas)
        xmid = sconv_mid(h_real, x2, blk["w_norm_sconv"], blk["w_norm_h"],
                         blk["wy_b"], blk["by"], blk["wya_b"], blk["bya"], tm)

        # --- out = FFNSwiGLU(norm_ffn(x_mid)) + x_mid, accumulate in o_ref (Pallas)
        x2 = ffn(xmid, blk["w_norm_ffn"], blk["w12_b"], blk["b12"],
                 blk["w3_b"], blk["b3"], tm, tf)

    # --- final LayerNorm + token_out, vocab-tiled with cached LayerNorm (Pallas)
    logits = head(x2, p["ln_w"], p["ln_b"], p["wo_b"], p["bo"], tm, tv)
    return logits[:BL].reshape(B, L, vocab)


# ----------------------------------- main ------------------------------------

if __name__ == "__main__":
    depth = 2
    dim = 128            # lane-dense (multiple of 128)
    dim_ff_hidden = 256
    vocab_size = 256
    batch = 2
    seq = 8

    key = jax.random.PRNGKey(0)
    kp, kt = jax.random.split(key)
    raw_params = init_params(kp, depth, dim, dim_ff_hidden, vocab_size)
    params = prepare_params(raw_params)   # one-time bf16 cast + weight fusion
    tokens = jax.random.randint(kt, (batch, seq), 0, vocab_size, dtype=jnp.int32)

    fwd = jax.jit(sconv_lti_forward)
    logits = jax.block_until_ready(fwd(tokens, params))

    assert logits.shape == (batch, seq, vocab_size)
    assert bool(jnp.all(jnp.isfinite(logits)))
    print("KERNEL_OK")
</pallas_src>

<mosaic_0001>
module attributes {stable_mosaic.version = 11 : i64} {
  func.func @sconv_in_kernel(%arg0: i32, %arg1: i32, %arg2: memref<16x128xf32, #tpu.memory_space<vmem>>, %arg3: memref<1x128xf32, #tpu.memory_space<vmem>>, %arg4: memref<128x256xbf16, #tpu.memory_space<vmem>>, %arg5: memref<1x256xf32, #tpu.memory_space<vmem>>, %arg6: memref<16x128xf32, #tpu.memory_space<vmem>>, %arg7: memref<16x128xbf16, #tpu.memory_space<vmem>>) attributes {dimension_semantics = [#tpu.dimension_semantics<parallel>, #tpu.dimension_semantics<arbitrary>], iteration_bounds = array<i64: 1, 1>, scalar_prefetch = 0 : i64, scratch_operands = 1 : i64, tpu.core_type = #tpu.core_type<tc>, window_params = [{transform_indices = @transform_0, window_bounds = array<i64: 16, 128>}, {pipeline_mode = #tpu.pipeline_mode<synchronous>, transform_indices = @transform_1, window_bounds = array<i64: 1, 128>}, {transform_indices = @transform_2, window_bounds = array<i64: 128, 256>}, {transform_indices = @transform_3, window_bounds = array<i64: 1, 256>}, {transform_indices = @transform_4, window_bounds = array<i64: 16, 128>}]} {
    %c0_i32 = arith.constant 0 : i32
    %0 = arith.cmpi eq, %arg1, %c0_i32 : i32
    %1 = arith.extui %0 : i1 to i32
    %c0_i32_0 = arith.constant 0 : i32
    %2 = arith.cmpi ne, %1, %c0_i32_0 : i32
    scf.if %2 {
      %c0_9 = arith.constant 0 : index
      %c0_10 = arith.constant 0 : index
      %19 = vector.load %arg2[%c0_9, %c0_10] : memref<16x128xf32, #tpu.memory_space<vmem>>, vector<16x128xf32>
      %c0_11 = arith.constant 0 : index
      %c0_12 = arith.constant 0 : index
      %20 = vector.load %arg3[%c0_11, %c0_12] : memref<1x128xf32, #tpu.memory_space<vmem>>, vector<1x128xf32>
      %21 = arith.mulf %19, %19 : vector<16x128xf32>
      %cst_13 = arith.constant dense<0.000000e+00> : vector<16xf32>
      %22 = vector.multi_reduction <add>, %21, %cst_13 [1] : vector<16x128xf32> to vector<16xf32>
      %23 = vector.shape_cast %22 : vector<16xf32> to vector<16x1xf32>
      %cst_14 = arith.constant 1.280000e+02 : f32
      %24 = vector.broadcast %cst_14 : f32 to vector<16x1xf32>
      %25 = arith.divf %23, %24 : vector<16x1xf32>
      %cst_15 = arith.constant 9.99999997E-7 : f32
      %26 = vector.broadcast %cst_15 : f32 to vector<16x1xf32>
      %27 = arith.addf %25, %26 : vector<16x1xf32>
      %28 = math.rsqrt %27 : vector<16x1xf32>
      %29 = vector.broadcast %28 : vector<16x1xf32> to vector<16x128xf32>
      %30 = arith.mulf %19, %29 : vector<16x128xf32>
      %31 = vector.broadcast %20 : vector<1x128xf32> to vector<16x128xf32>
      %32 = arith.mulf %30, %31 : vector<16x128xf32>
      %33 = arith.truncf %32 : vector<16x128xf32> to vector<16x128xbf16>
      %c0_16 = arith.constant 0 : index
      %c0_17 = arith.constant 0 : index
      %34 = vector.load %arg7[%c0_16, %c0_17] : memref<16x128xbf16, #tpu.memory_space<vmem>>, vector<16x128xbf16>
      tpu.vector_store %arg7[%c0_16, %c0_17], %33 {strides = array<i32>} : memref<16x128xbf16, #tpu.memory_space<vmem>>, vector<16x128xbf16>,
    } else {
    }
    %c0 = arith.constant 0 : index
    %c0_1 = arith.constant 0 : index
    %3 = vector.load %arg7[%c0, %c0_1] : memref<16x128xbf16, #tpu.memory_space<vmem>>, vector<16x128xbf16>
    %c0_2 = arith.constant 0 : index
    %c0_3 = arith.constant 0 : index
    %4 = vector.load %arg4[%c0_2, %c0_3] : memref<128x256xbf16, #tpu.memory_space<vmem>>, vector<128x256xbf16>
    %cst = arith.constant dense<0.000000e+00> : vector<16x256xf32>
    %5 = tpu.matmul %3, %4, %cst {dimension_numbers = #tpu.dot_dimension_numbers<[1], [0], [0], [1], [0, 0, 1, 1], [], []>} : vector<16x128xbf16>, vector<128x256xbf16>, vector<16x256xf32> -> vector<16x256xf32>
    %c0_4 = arith.constant 0 : index
    %c0_5 = arith.constant 0 : index
    %6 = vector.load %arg5[%c0_4, %c0_5] : memref<1x256xf32, #tpu.memory_space<vmem>>, vector<1x256xf32>
    %7 = vector.broadcast %6 : vector<1x256xf32> to vector<16x256xf32>
    %8 = arith.addf %5, %7 : vector<16x256xf32>
    %9 = vector.extract_strided_slice %8 {offsets = [0, 0], sizes = [16, 128], strides = [1, 1]} : vector<16x256xf32> to vector<16x128xf32>
    %10 = vector.extract_strided_slice %8 {offsets = [0, 128], sizes = [16, 128], strides = [1, 1]} : vector<16x256xf32> to vector<16x128xf32>
    %11 = arith.negf %10 : vector<16x128xf32>
    %12 = math.exp %11 : vector<16x128xf32>
    %cst_6 = arith.constant 1.000000e+00 : f32
    %13 = vector.broadcast %cst_6 : f32 to vector<16x128xf32>
    %14 = arith.addf %13, %12 : vector<16x128xf32>
    %15 = arith.divf %13, %14 : vector<16x128xf32>
    %16 = arith.mulf %10, %15 : vector<16x128xf32>
    %17 = arith.mulf %9, %16 : vector<16x128xf32>
    %c0_7 = arith.constant 0 : index
    %c0_8 = arith.constant 0 : index
    %18 = vector.load %arg6[%c0_7, %c0_8] : memref<16x128xf32, #tpu.memory_space<vmem>>, vector<16x128xf32>
    tpu.vector_store %arg6[%c0_7, %c0_8], %17 {strides = array<i32>} : memref<16x128xf32, #tpu.memory_space<vmem>>, vector<16x128xf32>,
    return
  }
  func.func @transform_0(%arg0: i32, %arg1: i32) -> (i32, i32) {
    %c0_i32 = arith.constant 0 : i32
    %c0_i32_0 = arith.constant 0 : i32
    return %arg0, %c0_i32 : i32, i32
  }
  func.func @transform_1(%arg0: i32, %arg1: i32) -> (i32, i32) {
    %c0_i32 = arith.constant 0 : i32
    %c0_i32_0 = arith.constant 0 : i32
    %c0_i32_1 = arith.constant 0 : i32
    return %c0_i32, %c0_i32_0 : i32, i32
  }
  func.func @transform_2(%arg0: i32, %arg1: i32) -> (i32, i32) {
    %c0_i32 = arith.constant 0 : i32
    %c0_i32_0 = arith.constant 0 : i32
    return %c0_i32, %arg1 : i32, i32
  }
  func.func @transform_3(%arg0: i32, %arg1: i32) -> (i32, i32) {
    %c0_i32 = arith.constant 0 : i32
    %c0_i32_0 = arith.constant 0 : i32
    return %c0_i32, %arg1 : i32, i32
  }
  func.func @transform_4(%arg0: i32, %arg1: i32) -> (i32, i32) {
    %c0_i32 = arith.constant 0 : i32
    return %arg0, %arg1 : i32, i32
  }
}

module attributes {stable_mosaic.version = 11 : i64} {
  func.func @sconv_mid_kernel(%arg0: i32, %arg1: memref<16x128xbf16, #tpu.memory_space<vmem>>, %arg2: memref<16x128xf32, #tpu.memory_space<vmem>>, %arg3: memref<1x128xf32, #tpu.memory_space<vmem>>, %arg4: memref<1x128xf32, #tpu.memory_space<vmem>>, %arg5: memref<128x128xbf16, #tpu.memory_space<vmem>>, %arg6: memref<1x128xf32, #tpu.memory_space<vmem>>, %arg7: memref<128x128xbf16, #tpu.memory_space<vmem>>, %arg8: memref<1x128xf32, #tpu.memory_space<vmem>>, %arg9: memref<16x128xf32, #tpu.memory_space<vmem>>) attributes {dimension_semantics = [#tpu.dimension_semantics<parallel>], iteration_bounds = array<i64: 1>, scalar_prefetch = 0 : i64, scratch_operands = 0 : i64, tpu.core_type = #tpu.core_type<tc>, window_params = [{transform_indices = @transform_0, window_bounds = array<i64: 16, 128>}, {transform_indices = @transform_1, window_bounds = array<i64: 16, 128>}, {pipeline_mode = #tpu.pipeline_mode<synchronous>, transform_indices = @transform_2, window_bounds = array<i64: 1, 128>}, {pipeline_mode = #tpu.pipeline_mode<synchronous>, transform_indices = @transform_3, window_bounds = array<i64: 1, 128>}, {pipeline_mode = #tpu.pipeline_mode<synchronous>, transform_indices = @transform_4, window_bounds = array<i64: 128, 128>}, {pipeline_mode = #tpu.pipeline_mode<synchronous>, transform_indices = @transform_5, window_bounds = array<i64: 1, 128>}, {pipeline_mode = #tpu.pipeline_mode<synchronous>, transform_indices = @transform_6, window_bounds = array<i64: 128, 128>}, {pipeline_mode = #tpu.pipeline_mode<synchronous>, transform_indices = @transform_7, window_bounds = array<i64: 1, 128>}, {transform_indices = @transform_8, window_bounds = array<i64: 16, 128>}]} {
    %c0 = arith.constant 0 : index
    %c0_0 = arith.constant 0 : index
    %0 = vector.load %arg2[%c0, %c0_0] : memref<16x128xf32, #tpu.memory_space<vmem>>, vector<16x128xf32>
    %c0_1 = arith.constant 0 : index
    %c0_2 = arith.constant 0 : index
    %1 = vector.load %arg3[%c0_1, %c0_2] : memref<1x128xf32, #tpu.memory_space<vmem>>, vector<1x128xf32>
    %2 = arith.mulf %0, %0 : vector<16x128xf32>
    %cst = arith.constant dense<0.000000e+00> : vector<16xf32>
    %3 = vector.multi_reduction <add>, %2, %cst [1] : vector<16x128xf32> to vector<16xf32>
    %4 = vector.shape_cast %3 : vector<16xf32> to vector<16x1xf32>
    %cst_3 = arith.constant 1.280000e+02 : f32
    %5 = vector.broadcast %cst_3 : f32 to vector<16x1xf32>
    %6 = arith.divf %4, %5 : vector<16x1xf32>
    %cst_4 = arith.constant 9.99999997E-7 : f32
    %7 = vector.broadcast %cst_4 : f32 to vector<16x1xf32>
    %8 = arith.addf %6, %7 : vector<16x1xf32>
    %9 = math.rsqrt %8 : vector<16x1xf32>
    %10 = vector.broadcast %9 : vector<16x1xf32> to vector<16x128xf32>
    %11 = arith.mulf %0, %10 : vector<16x128xf32>
    %12 = vector.broadcast %1 : vector<1x128xf32> to vector<16x128xf32>
    %13 = arith.mulf %11, %12 : vector<16x128xf32>
    %14 = arith.truncf %13 : vector<16x128xf32> to vector<16x128xbf16>
    %c0_5 = arith.constant 0 : index
    %c0_6 = arith.constant 0 : index
    %15 = vector.load %arg1[%c0_5, %c0_6] : memref<16x128xbf16, #tpu.memory_space<vmem>>, vector<16x128xbf16>
    %16 = arith.extf %15 : vector<16x128xbf16> to vector<16x128xf32>
    %c0_7 = arith.constant 0 : index
    %c0_8 = arith.constant 0 : index
    %17 = vector.load %arg4[%c0_7, %c0_8] : memref<1x128xf32, #tpu.memory_space<vmem>>, vector<1x128xf32>
    %18 = arith.mulf %16, %16 : vector<16x128xf32>
    %cst_9 = arith.constant dense<0.000000e+00> : vector<16xf32>
    %19 = vector.multi_reduction <add>, %18, %cst_9 [1] : vector<16x128xf32> to vector<16xf32>
    %20 = vector.shape_cast %19 : vector<16xf32> to vector<16x1xf32>
    %cst_10 = arith.constant 1.280000e+02 : f32
    %21 = vector.broadcast %cst_10 : f32 to vector<16x1xf32>
    %22 = arith.divf %20, %21 : vector<16x1xf32>
    %cst_11 = arith.constant 9.99999997E-7 : f32
    %23 = vector.broadcast %cst_11 : f32 to vector<16x1xf32>
    %24 = arith.addf %22, %23 : vector<16x1xf32>
    %25 = math.rsqrt %24 : vector<16x1xf32>
    %26 = vector.broadcast %25 : vector<16x1xf32> to vector<16x128xf32>
    %27 = arith.mulf %16, %26 : vector<16x128xf32>
    %28 = vector.broadcast %17 : vector<1x128xf32> to vector<16x128xf32>
    %29 = arith.mulf %27, %28 : vector<16x128xf32>
    %30 = arith.truncf %29 : vector<16x128xf32> to vector<16x128xbf16>
    %c0_12 = arith.constant 0 : index
    %c0_13 = arith.constant 0 : index
    %31 = vector.load %arg5[%c0_12, %c0_13] : memref<128x128xbf16, #tpu.memory_space<vmem>>, vector<128x128xbf16>
    %cst_14 = arith.constant dense<0.000000e+00> : vector<16x128xf32>
    %32 = tpu.matmul %30, %31, %cst_14 {dimension_numbers = #tpu.dot_dimension_numbers<[1], [0], [0], [1], [0, 0, 1, 1], [], []>} : vector<16x128xbf16>, vector<128x128xbf16>, vector<16x128xf32> -> vector<16x128xf32>
    %c0_15 = arith.constant 0 : index
    %c0_16 = arith.constant 0 : index
    %33 = vector.load %arg6[%c0_15, %c0_16] : memref<1x128xf32, #tpu.memory_space<vmem>>, vector<1x128xf32>
    %34 = vector.broadcast %33 : vector<1x128xf32> to vector<16x128xf32>
    %35 = arith.addf %32, %34 : vector<16x128xf32>
    %c0_17 = arith.constant 0 : index
    %c0_18 = arith.constant 0 : index
    %36 = vector.load %arg7[%c0_17, %c0_18] : memref<128x128xbf16, #tpu.memory_space<vmem>>, vector<128x128xbf16>
    %cst_19 = arith.constant dense<0.000000e+00> : vector<16x128xf32>
    %37 = tpu.matmul %14, %36, %cst_19 {dimension_numbers = #tpu.dot_dimension_numbers<[1], [0], [0], [1], [0, 0, 1, 1], [], []>} : vector<16x128xbf16>, vector<128x128xbf16>, vector<16x128xf32> -> vector<16x128xf32>
    %c0_20 = arith.constant 0 : index
    %c0_21 = arith.constant 0 : index
    %38 = vector.load %arg8[%c0_20, %c0_21] : memref<1x128xf32, #tpu.memory_space<vmem>>, vector<1x128xf32>
    %39 = vector.broadcast %38 : vector<1x128xf32> to vector<16x128xf32>
    %40 = arith.addf %37, %39 : vector<16x128xf32>
    %41 = arith.negf %40 : vector<16x128xf32>
    %42 = math.exp %41 : vector<16x128xf32>
    %cst_22 = arith.constant 1.000000e+00 : f32
    %43 = vector.broadcast %cst_22 : f32 to vector<16x128xf32>
    %44 = arith.addf %43, %42 : vector<16x128xf32>
    %45 = arith.divf %43, %44 : vector<16x128xf32>
    %46 = arith.mulf %40, %45 : vector<16x128xf32>
    %47 = arith.mulf %35, %46 : vector<16x128xf32>
    %48 = arith.addf %47, %0 : vector<16x128xf32>
    %c0_23 = arith.constant 0 : index
    %c0_24 = arith.constant 0 : index
    %49 = vector.load %arg9[%c0_23, %c0_24] : memref<16x128xf32, #tpu.memory_space<vmem>>, vector<16x128xf32>
    tpu.vector_store %arg9[%c0_23, %c0_24], %48 {strides = array<i32>} : memref<16x128xf32, #tpu.memory_space<vmem>>, vector<16x128xf32>,
    return
  }
  func.func @transform_0(%arg0: i32) -> (i32, i32) {
    %c0_i32 = arith.constant 0 : i32
    %c0_i32_0 = arith.constant 0 : i32
    return %arg0, %c0_i32 : i32, i32
  }
  func.func @transform_1(%arg0: i32) -> (i32, i32) {
    %c0_i32 = arith.constant 0 : i32
    %c0_i32_0 = arith.constant 0 : i32
    return %arg0, %c0_i32 : i32, i32
  }
  func.func @transform_2(%arg0: i32) -> (i32, i32) {
    %c0_i32 = arith.constant 0 : i32
    %c0_i32_0 = arith.constant 0 : i32
    %c0_i32_1 = arith.constant 0 : i32
    return %c0_i32, %c0_i32_0 : i32, i32
  }
  func.func @transform_3(%arg0: i32) -> (i32, i32) {
    %c0_i32 = arith.constant 0 : i32
    %c0_i32_0 = arith.constant 0 : i32
    %c0_i32_1 = arith.constant 0 : i32
    return %c0_i32, %c0_i32_0 : i32, i32
  }
  func.func @transform_4(%arg0: i32) -> (i32, i32) {
    %c0_i32 = arith.constant 0 : i32
    %c0_i32_0 = arith.constant 0 : i32
    %c0_i32_1 = arith.constant 0 : i32
    return %c0_i32, %c0_i32_0 : i32, i32
  }
  func.func @transform_5(%arg0: i32) -> (i32, i32) {
    %c0_i32 = arith.constant 0 : i32
    %c0_i32_0 = arith.constant 0 : i32
    %c0_i32_1 = arith.constant 0 : i32
    return %c0_i32, %c0_i32_0 : i32, i32
  }
  func.func @transform_6(%arg0: i32) -> (i32, i32) {
    %c0_i32 = arith.constant 0 : i32
    %c0_i32_0 = arith.constant 0 : i32
    %c0_i32_1 = arith.constant 0 : i32
    return %c0_i32, %c0_i32_0 : i32, i32
  }
  func.func @transform_7(%arg0: i32) -> (i32, i32) {
    %c0_i32 = arith.constant 0 : i32
    %c0_i32_0 = arith.constant 0 : i32
    %c0_i32_1 = arith.constant 0 : i32
    return %c0_i32, %c0_i32_0 : i32, i32
  }
  func.func @transform_8(%arg0: i32) -> (i32, i32) {
    %c0_i32 = arith.constant 0 : i32
    %c0_i32_0 = arith.constant 0 : i32
    return %arg0, %c0_i32 : i32, i32
  }
}

module attributes {stable_mosaic.version = 11 : i64} {
  func.func @head_kernel(%arg0: i32, %arg1: i32, %arg2: memref<16x128xf32, #tpu.memory_space<vmem>>, %arg3: memref<1x128xf32, #tpu.memory_space<vmem>>, %arg4: memref<1x128xf32, #tpu.memory_space<vmem>>, %arg5: memref<128x256xbf16, #tpu.memory_space<vmem>>, %arg6: memref<1x256xf32, #tpu.memory_space<vmem>>, %arg7: memref<16x256xf32, #tpu.memory_space<vmem>>, %arg8: memref<16x128xbf16, #tpu.memory_space<vmem>>) attributes {dimension_semantics = [#tpu.dimension_semantics<parallel>, #tpu.dimension_semantics<arbitrary>], iteration_bounds = array<i64: 1, 1>, scalar_prefetch = 0 : i64, scratch_operands = 1 : i64, tpu.core_type = #tpu.core_type<tc>, window_params = [{transform_indices = @transform_0, window_bounds = array<i64: 16, 128>}, {pipeline_mode = #tpu.pipeline_mode<synchronous>, transform_indices = @transform_1, window_bounds = array<i64: 1, 128>}, {pipeline_mode = #tpu.pipeline_mode<synchronous>, transform_indices = @transform_2, window_bounds = array<i64: 1, 128>}, {transform_indices = @transform_3, window_bounds = array<i64: 128, 256>}, {transform_indices = @transform_4, window_bounds = array<i64: 1, 256>}, {transform_indices = @transform_5, window_bounds = array<i64: 16, 256>}]} {
    %c0_i32 = arith.constant 0 : i32
    %0 = arith.cmpi eq, %arg1, %c0_i32 : i32
    %1 = arith.extui %0 : i1 to i32
    %c0_i32_0 = arith.constant 0 : i32
    %2 = arith.cmpi ne, %1, %c0_i32_0 : i32
    scf.if %2 {
      %c0_8 = arith.constant 0 : index
      %c0_9 = arith.constant 0 : index
      %10 = vector.load %arg2[%c0_8, %c0_9] : memref<16x128xf32, #tpu.memory_space<vmem>>, vector<16x128xf32>
      %cst_10 = arith.constant dense<0.000000e+00> : vector<16xf32>
      %11 = vector.multi_reduction <add>, %10, %cst_10 [1] : vector<16x128xf32> to vector<16xf32>
      %12 = vector.shape_cast %11 : vector<16xf32> to vector<16x1xf32>
      %cst_11 = arith.constant 1.280000e+02 : f32
      %13 = vector.broadcast %cst_11 : f32 to vector<16x1xf32>
      %14 = arith.divf %12, %13 : vector<16x1xf32>
      %15 = vector.broadcast %14 : vector<16x1xf32> to vector<16x128xf32>
      %16 = arith.subf %10, %15 : vector<16x128xf32>
      %17 = arith.mulf %16, %16 : vector<16x128xf32>
      %cst_12 = arith.constant dense<0.000000e+00> : vector<16xf32>
      %18 = vector.multi_reduction <add>, %17, %cst_12 [1] : vector<16x128xf32> to vector<16xf32>
      %19 = vector.shape_cast %18 : vector<16xf32> to vector<16x1xf32>
      %cst_13 = arith.constant 1.280000e+02 : f32
      %20 = vector.broadcast %cst_13 : f32 to vector<16x1xf32>
      %21 = arith.divf %19, %20 : vector<16x1xf32>
      %22 = vector.broadcast %14 : vector<16x1xf32> to vector<16x128xf32>
      %23 = arith.subf %10, %22 : vector<16x128xf32>
      %cst_14 = arith.constant 9.99999974E-6 : f32
      %24 = vector.broadcast %cst_14 : f32 to vector<16x1xf32>
      %25 = arith.addf %21, %24 : vector<16x1xf32>
      %26 = math.rsqrt %25 : vector<16x1xf32>
      %27 = vector.broadcast %26 : vector<16x1xf32> to vector<16x128xf32>
      %28 = arith.mulf %23, %27 : vector<16x128xf32>
      %c0_15 = arith.constant 0 : index
      %c0_16 = arith.constant 0 : index
      %29 = vector.load %arg3[%c0_15, %c0_16] : memref<1x128xf32, #tpu.memory_space<vmem>>, vector<1x128xf32>
      %30 = vector.broadcast %29 : vector<1x128xf32> to vector<16x128xf32>
      %31 = arith.mulf %28, %30 : vector<16x128xf32>
      %c0_17 = arith.constant 0 : index
      %c0_18 = arith.constant 0 : index
      %32 = vector.load %arg4[%c0_17, %c0_18] : memref<1x128xf32, #tpu.memory_space<vmem>>, vector<1x128xf32>
      %33 = vector.broadcast %32 : vector<1x128xf32> to vector<16x128xf32>
      %34 = arith.addf %31, %33 : vector<16x128xf32>
      %35 = arith.truncf %34 : vector<16x128xf32> to vector<16x128xbf16>
      %c0_19 = arith.constant 0 : index
      %c0_20 = arith.constant 0 : index
      %36 = vector.load %arg8[%c0_19, %c0_20] : memref<16x128xbf16, #tpu.memory_space<vmem>>, vector<16x128xbf16>
      tpu.vector_store %arg8[%c0_19, %c0_20], %35 {strides = array<i32>} : memref<16x128xbf16, #tpu.memory_space<vmem>>, vector<16x128xbf16>,
    } else {
    }
    %c0 = arith.constant 0 : index
    %c0_1 = arith.constant 0 : index
    %3 = vector.load %arg8[%c0, %c0_1] : memref<16x128xbf16, #tpu.memory_space<vmem>>, vector<16x128xbf16>
    %c0_2 = arith.constant 0 : index
    %c0_3 = arith.constant 0 : index
    %4 = vector.load %arg5[%c0_2, %c0_3] : memref<128x256xbf16, #tpu.memory_space<vmem>>, vector<128x256xbf16>
    %cst = arith.constant dense<0.000000e+00> : vector<16x256xf32>
    %5 = tpu.matmul %3, %4, %cst {dimension_numbers = #tpu.dot_dimension_numbers<[1], [0], [0], [1], [0, 0, 1, 1], [], []>} : vector<16x128xbf16>, vector<128x256xbf16>, vector<16x256xf32> -> vector<16x256xf32>
    %c0_4 = arith.constant 0 : index
    %c0_5 = arith.constant 0 : index
    %6 = vector.load %arg6[%c0_4, %c0_5] : memref<1x256xf32, #tpu.memory_space<vmem>>, vector<1x256xf32>
    %7 = vector.broadcast %6 : vector<1x256xf32> to vector<16x256xf32>
    %8 = arith.addf %5, %7 : vector<16x256xf32>
    %c0_6 = arith.constant 0 : index
    %c0_7 = arith.constant 0 : index
    %9 = vector.load %arg7[%c0_6, %c0_7] : memref<16x256xf32, #tpu.memory_space<vmem>>, vector<16x256xf32>
    tpu.vector_store %arg7[%c0_6, %c0_7], %8 {strides = array<i32>} : memref<16x256xf32, #tpu.memory_space<vmem>>, vector<16x256xf32>,
    return
  }
  func.func @transform_0(%arg0: i32, %arg1: i32) -> (i32, i32) {
    %c0_i32 = arith.constant 0 : i32
    %c0_i32_0 = arith.constant 0 : i32
    return %arg0, %c0_i32 : i32, i32
  }
  func.func @transform_1(%arg0: i32, %arg1: i32) -> (i32, i32) {
    %c0_i32 = arith.constant 0 : i32
    %c0_i32_0 = arith.constant 0 : i32
    %c0_i32_1 = arith.constant 0 : i32
    return %c0_i32, %c0_i32_0 : i32, i32
  }
  func.func @transform_2(%arg0: i32, %arg1: i32) -> (i32, i32) {
    %c0_i32 = arith.constant 0 : i32
    %c0_i32_0 = arith.constant 0 : i32
    %c0_i32_1 = arith.constant 0 : i32
    return %c0_i32, %c0_i32_0 : i32, i32
  }
  func.func @transform_3(%arg0: i32, %arg1: i32) -> (i32, i32) {
    %c0_i32 = arith.constant 0 : i32
    %c0_i32_0 = arith.constant 0 : i32
    return %c0_i32, %arg1 : i32, i32
  }
  func.func @transform_4(%arg0: i32, %arg1: i32) -> (i32, i32) {
    %c0_i32 = arith.constant 0 : i32
    %c0_i32_0 = arith.constant 0 : i32
    return %c0_i32, %arg1 : i32, i32
  }
  func.func @transform_5(%arg0: i32, %arg1: i32) -> (i32, i32) {
    %c0_i32 = arith.constant 0 : i32
    return %arg0, %arg1 : i32, i32
  }
}

module attributes {stable_mosaic.version = 11 : i64} {
  func.func @ffn_kernel(%arg0: i32, %arg1: i32, %arg2: memref<16x128xf32, #tpu.memory_space<vmem>>, %arg3: memref<1x128xf32, #tpu.memory_space<vmem>>, %arg4: memref<128x512xbf16, #tpu.memory_space<vmem>>, %arg5: memref<1x512xf32, #tpu.memory_space<vmem>>, %arg6: memref<256x128xbf16, #tpu.memory_space<vmem>>, %arg7: memref<1x128xf32, #tpu.memory_space<vmem>>, %arg8: memref<16x128xf32, #tpu.memory_space<vmem>>, %arg9: memref<16x128xbf16, #tpu.memory_space<vmem>>) attributes {dimension_semantics = [#tpu.dimension_semantics<parallel>, #tpu.dimension_semantics<arbitrary>], iteration_bounds = array<i64: 1, 1>, scalar_prefetch = 0 : i64, scratch_operands = 1 : i64, tpu.core_type = #tpu.core_type<tc>, window_params = [{transform_indices = @transform_0, window_bounds = array<i64: 16, 128>}, {pipeline_mode = #tpu.pipeline_mode<synchronous>, transform_indices = @transform_1, window_bounds = array<i64: 1, 128>}, {transform_indices = @transform_2, window_bounds = array<i64: 128, 512>}, {transform_indices = @transform_3, window_bounds = array<i64: 1, 512>}, {transform_indices = @transform_4, window_bounds = array<i64: 256, 128>}, {pipeline_mode = #tpu.pipeline_mode<synchronous>, transform_indices = @transform_5, window_bounds = array<i64: 1, 128>}, {transform_indices = @transform_6, window_bounds = array<i64: 16, 128>}]} {
    %c0_i32 = arith.constant 0 : i32
    %0 = arith.cmpi eq, %arg1, %c0_i32 : i32
    %1 = arith.extui %0 : i1 to i32
    %c0_i32_0 = arith.constant 0 : i32
    %2 = arith.cmpi ne, %1, %c0_i32_0 : i32
    scf.if %2 {
      %c0_16 = arith.constant 0 : index
      %c0_17 = arith.constant 0 : index
      %27 = vector.load %arg2[%c0_16, %c0_17] : memref<16x128xf32, #tpu.memory_space<vmem>>, vector<16x128xf32>
      %c0_18 = arith.constant 0 : index
      %c0_19 = arith.constant 0 : index
      %28 = vector.load %arg3[%c0_18, %c0_19] : memref<1x128xf32, #tpu.memory_space<vmem>>, vector<1x128xf32>
      %29 = arith.mulf %27, %27 : vector<16x128xf32>
      %cst_20 = arith.constant dense<0.000000e+00> : vector<16xf32>
      %30 = vector.multi_reduction <add>, %29, %cst_20 [1] : vector<16x128xf32> to vector<16xf32>
      %31 = vector.shape_cast %30 : vector<16xf32> to vector<16x1xf32>
      %cst_21 = arith.constant 1.280000e+02 : f32
      %32 = vector.broadcast %cst_21 : f32 to vector<16x1xf32>
      %33 = arith.divf %31, %32 : vector<16x1xf32>
      %cst_22 = arith.constant 9.99999997E-7 : f32
      %34 = vector.broadcast %cst_22 : f32 to vector<16x1xf32>
      %35 = arith.addf %33, %34 : vector<16x1xf32>
      %36 = math.rsqrt %35 : vector<16x1xf32>
      %37 = vector.broadcast %36 : vector<16x1xf32> to vector<16x128xf32>
      %38 = arith.mulf %27, %37 : vector<16x128xf32>
      %39 = vector.broadcast %28 : vector<1x128xf32> to vector<16x128xf32>
      %40 = arith.mulf %38, %39 : vector<16x128xf32>
      %41 = arith.truncf %40 : vector<16x128xf32> to vector<16x128xbf16>
      %c0_23 = arith.constant 0 : index
      %c0_24 = arith.constant 0 : index
      %42 = vector.load %arg9[%c0_23, %c0_24] : memref<16x128xbf16, #tpu.memory_space<vmem>>, vector<16x128xbf16>
      tpu.vector_store %arg9[%c0_23, %c0_24], %41 {strides = array<i32>} : memref<16x128xbf16, #tpu.memory_space<vmem>>, vector<16x128xbf16>,
      %c0_25 = arith.constant 0 : index
      %c0_26 = arith.constant 0 : index
      %43 = vector.load %arg8[%c0_25, %c0_26] : memref<16x128xf32, #tpu.memory_space<vmem>>, vector<16x128xf32>
      tpu.vector_store %arg8[%c0_25, %c0_26], %27 {strides = array<i32>} : memref<16x128xf32, #tpu.memory_space<vmem>>, vector<16x128xf32>,
    } else {
    }
    %c0 = arith.constant 0 : index
    %c0_1 = arith.constant 0 : index
    %3 = vector.load %arg9[%c0, %c0_1] : memref<16x128xbf16, #tpu.memory_space<vmem>>, vector<16x128xbf16>
    %c0_2 = arith.constant 0 : index
    %c0_3 = arith.constant 0 : index
    %4 = vector.load %arg4[%c0_2, %c0_3] : memref<128x512xbf16, #tpu.memory_space<vmem>>, vector<128x512xbf16>
    %cst = arith.constant dense<0.000000e+00> : vector<16x512xf32>
    %5 = tpu.matmul %3, %4, %cst {dimension_numbers = #tpu.dot_dimension_numbers<[1], [0], [0], [1], [0, 0, 1, 1], [], []>} : vector<16x128xbf16>, vector<128x512xbf16>, vector<16x512xf32> -> vector<16x512xf32>
    %c0_4 = arith.constant 0 : index
    %c0_5 = arith.constant 0 : index
    %6 = vector.load %arg5[%c0_4, %c0_5] : memref<1x512xf32, #tpu.memory_space<vmem>>, vector<1x512xf32>
    %7 = vector.broadcast %6 : vector<1x512xf32> to vector<16x512xf32>
    %8 = arith.addf %5, %7 : vector<16x512xf32>
    %9 = vector.extract_strided_slice %8 {offsets = [0, 0], sizes = [16, 256], strides = [1, 1]} : vector<16x512xf32> to vector<16x256xf32>
    %10 = vector.extract_strided_slice %8 {offsets = [0, 256], sizes = [16, 256], strides = [1, 1]} : vector<16x512xf32> to vector<16x256xf32>
    %11 = arith.negf %10 : vector<16x256xf32>
    %12 = math.exp %11 : vector<16x256xf32>
    %cst_6 = arith.constant 1.000000e+00 : f32
    %13 = vector.broadcast %cst_6 : f32 to vector<16x256xf32>
    %14 = arith.addf %13, %12 : vector<16x256xf32>
    %15 = arith.divf %13, %14 : vector<16x256xf32>
    %16 = arith.mulf %10, %15 : vector<16x256xf32>
    %17 = arith.mulf %9, %16 : vector<16x256xf32>
    %18 = arith.truncf %17 : vector<16x256xf32> to vector<16x256xbf16>
    %c0_7 = arith.constant 0 : index
    %c0_8 = arith.constant 0 : index
    %19 = vector.load %arg8[%c0_7, %c0_8] : memref<16x128xf32, #tpu.memory_space<vmem>>, vector<16x128xf32>
    %c0_9 = arith.constant 0 : index
    %c0_10 = arith.constant 0 : index
    %20 = vector.load %arg6[%c0_9, %c0_10] : memref<256x128xbf16, #tpu.memory_space<vmem>>, vector<256x128xbf16>
    %cst_11 = arith.constant dense<0.000000e+00> : vector<16x128xf32>
    %21 = tpu.matmul %18, %20, %cst_11 {dimension_numbers = #tpu.dot_dimension_numbers<[1], [0], [0], [1], [0, 0, 1, 1], [], []>} : vector<16x256xbf16>, vector<256x128xbf16>, vector<16x128xf32> -> vector<16x128xf32>
    %22 = arith.addf %19, %21 : vector<16x128xf32>
    %c0_12 = arith.constant 0 : index
    %c0_13 = arith.constant 0 : index
    %23 = vector.load %arg8[%c0_12, %c0_13] : memref<16x128xf32, #tpu.memory_space<vmem>>, vector<16x128xf32>
    tpu.vector_store %arg8[%c0_12, %c0_13], %22 {strides = array<i32>} : memref<16x128xf32, #tpu.memory_space<vmem>>, vector<16x128xf32>,
    %c0_i32_14 = arith.constant 0 : i32
    %24 = arith.cmpi eq, %arg1, %c0_i32_14 : i32
    %25 = arith.extui %24 : i1 to i32
    %c0_i32_15 = arith.constant 0 : i32
    %26 = arith.cmpi ne, %25, %c0_i32_15 : i32
    scf.if %26 {
      %c0_16 = arith.constant 0 : index
      %c0_17 = arith.constant 0 : index
      %27 = vector.load %arg8[%c0_16, %c0_17] : memref<16x128xf32, #tpu.memory_space<vmem>>, vector<16x128xf32>
      %c0_18 = arith.constant 0 : index
      %c0_19 = arith.constant 0 : index
      %28 = vector.load %arg7[%c0_18, %c0_19] : memref<1x128xf32, #tpu.memory_space<vmem>>, vector<1x128xf32>
      %29 = vector.broadcast %28 : vector<1x128xf32> to vector<16x128xf32>
      %30 = arith.addf %27, %29 : vector<16x128xf32>
      %c0_20 = arith.constant 0 : index
      %c0_21 = arith.constant 0 : index
      %31 = vector.load %arg8[%c0_20, %c0_21] : memref<16x128xf32, #tpu.memory_space<vmem>>, vector<16x128xf32>
      tpu.vector_store %arg8[%c0_20, %c0_21], %30 {strides = array<i32>} : memref<16x128xf32, #tpu.memory_space<vmem>>, vector<16x128xf32>,
    } else {
    }
    return
  }
  func.func @transform_0(%arg0: i32, %arg1: i32) -> (i32, i32) {
    %c0_i32 = arith.constant 0 : i32
    %c0_i32_0 = arith.constant 0 : i32
    return %arg0, %c0_i32 : i32, i32
  }
  func.func @transform_1(%arg0: i32, %arg1: i32) -> (i32, i32) {
    %c0_i32 = arith.constant 0 : i32
    %c0_i32_0 = arith.constant 0 : i32
    %c0_i32_1 = arith.constant 0 : i32
    return %c0_i32, %c0_i32_0 : i32, i32
  }
  func.func @transform_2(%arg0: i32, %arg1: i32) -> (i32, i32) {
    %c0_i32 = arith.constant 0 : i32
    %c0_i32_0 = arith.constant 0 : i32
    return %c0_i32, %arg1 : i32, i32
  }
  func.func @transform_3(%arg0: i32, %arg1: i32) -> (i32, i32) {
    %c0_i32 = arith.constant 0 : i32
    %c0_i32_0 = arith.constant 0 : i32
    return %c0_i32, %arg1 : i32, i32
  }
  func.func @transform_4(%arg0: i32, %arg1: i32) -> (i32, i32) {
    %c0_i32 = arith.constant 0 : i32
    %c0_i32_0 = arith.constant 0 : i32
    return %arg1, %c0_i32 : i32, i32
  }
  func.func @transform_5(%arg0: i32, %arg1: i32) -> (i32, i32) {
    %c0_i32 = arith.constant 0 : i32
    %c0_i32_0 = arith.constant 0 : i32
    %c0_i32_1 = arith.constant 0 : i32
    return %c0_i32, %c0_i32_0 : i32, i32
  }
  func.func @transform_6(%arg0: i32, %arg1: i32) -> (i32, i32) {
    %c0_i32 = arith.constant 0 : i32
    %c0_i32_0 = arith.constant 0 : i32
    return %arg0, %c0_i32 : i32, i32
  }
}

</mosaic_0001>

<bundles_post_ra>
// kernel: custom-call.1
= control target key start
LH: loop header
LB: loop body
LE: loop exit
PB: predicated region body
PF: predicated region fallthrough
CT: control target
= control target key end

     0   :  { %s51_s0 = inlined_call_operand.hbm [shape: c64[128], index: 0, kind: input, shape index: {}]   ;;  %s52_s1 = inlined_call_operand.vmem [shape: f32[128], index: 1, kind: output, shape index: {}]  }
   0x1   :  { %s2_s8 = scalar_lea.hbm %s51_s0, 16 }
   0x2   :  { %3 = vsyncpa [#allocation0], 0  ;;  %s4_s11 = sshll.u32 %s52_s1, 4  ;;  %s5_s11 = int_to_ptr.vmem [resolvable:$true] %s4_s11 }
   0x3   :  { %s20_s12 = scalar_lea.vmem %s5_s11, 16  ;;  %p25_p1 = scmp.lt.s32.totalorder %s5_s11, %s5_s11 }
   0x4   :  { %p21_p0 = scmp.ne.s32.totalorder %s5_s11, %s20_s12  ;;  %p26_p2 = scmp.lt.s32.totalorder %s20_s12, %s20_s12 }
   0x6   :  { %p27_p3 = por %p26_p2, %p25_p1 }
   0x8   :  { %p28_p4 = pnand %p27_p3, %p21_p0 }
   0xa   :  { %31 = shalt.err (!%p28_p4)  }
   0xb   :  { %7 = dma.hbm_to_vmem [thread:$0]  %s2_s8, 16, %s5_s11, [#allocation0] }
   0xc   :  { %33 = dma.done.wait [#allocation0], 16  }
   0xd   :  { %34 = vsyncadd [#allocation0], 4294967280 }
   0xe   :  { %9 = vsyncpa [#allocation0], 1 }

// kernel: custom-call
= control target key start
LH: loop header
LB: loop body
LE: loop exit
PB: predicated region body
PF: predicated region fallthrough
CT: control target
= control target key end

     0   :  { %2 = vsyncpa [#allocation0], 0  ;;  %s47_s0 = inlined_call_operand.hbm [shape: c64[128], index: 0, kind: input, shape index: {}]   ;;  %s48_s1 = inlined_call_operand.vmem [shape: f32[128], index: 1, kind: output, shape index: {}]  }
   0x1   :  { %s3_s8 = sshll.u32 %s48_s1, 4  ;;  %s4_s8 = int_to_ptr.vmem [resolvable:$true] %s3_s8 }
   0x2   :  { %s17_s9 = scalar_lea.vmem %s4_s8, 16  ;;  %p22_p1 = scmp.lt.s32.totalorder %s4_s8, %s4_s8 }
   0x3   :  { %p18_p0 = scmp.ne.s32.totalorder %s4_s8, %s17_s9  ;;  %p23_p2 = scmp.lt.s32.totalorder %s17_s9, %s17_s9 }
   0x5   :  { %p24_p3 = por %p23_p2, %p22_p1 }
   0x7   :  { %p25_p4 = pnand %p24_p3, %p18_p0 }
   0x9   :  { %28 = shalt.err (!%p25_p4)  }
   0xa   :  { %6 = dma.hbm_to_vmem [thread:$0]  %s47_s0, 16, %s4_s8, [#allocation0] }
   0xb   :  { %29 = dma.done.wait [#allocation0], 16  }
   0xc   :  { %30 = vsyncadd [#allocation0], 4294967280 }
   0xd   :  { %8 = vsyncpa [#allocation0], 1 }

// kernel: sconv_lti_forward.7
= control target key start
LH: loop header
LB: loop body
LE: loop exit
PB: predicated region body
PF: predicated region fallthrough
CT: control target
= control target key end

     0   :  { %v306_v20 = vmov 0   ;;  %v78_v36 = vlaneseq  ;;  %s398_s0 = inlined_call_operand.vmem [shape: f32[16,128], index: 0, kind: input, shape index: {}]   ;;  %s399_s2 = inlined_call_operand.vmem [shape: bf16[128,256], index: 2, kind: input, shape index: {}]   ;;  %s400_s1 = inlined_call_operand.vmem [shape: f32[1,128], index: 1, kind: input, shape index: {}]   ;;  %s401_s3 = inlined_call_operand.vmem [shape: f32[1,256], index: 3, kind: input, shape index: {}]   ;;  %s402_s4 = inlined_call_operand.vmem [shape: f32[16,128], index: 4, kind: output, shape index: {}]  }
   0x1   :  { %v22_v0 = vld [vmem:[%s398_s0] sm:$0xff]  ;;  %v23_v1 = vld [vmem:[%s398_s0 + $0x8] sm:$0xff]  ;;  %v269_v4 = vld [vmem:[%s399_s2 + $0x74] ss:$8 sps:$4 sm:$0xff]   ;;  %206 = vmatprep.mubr.bf16.mxu0 %v306_v20 }
   0x2   :  { %v25_v2 = vmul.f32 %v22_v0, %v22_v0  ;;  %v26_v3 = vmul.f32 %v23_v1, %v23_v1  ;;  %v271_v5 = vld [vmem:[%s399_s2 + $0x70] ss:$8 sps:$4 sm:$0xff]   ;;  %174 = vmatprep.subr.bf16.mxu0 %v269_v4  ;;  %v272_v6 = vld [vmem:[%s399_s2 + $0x64] ss:$8 sps:$4 sm:$0xff]   ;;  %v274_v7 = vld [vmem:[%s399_s2 + $0x60] ss:$8 sps:$4 sm:$0xff]  }
   0x3   :  { %175 = vmatpush1.bf16.msra.mxu0 %v271_v5  ;;  %v275_v8 = vld [vmem:[%s399_s2 + $0x54] ss:$8 sps:$4 sm:$0xff]   ;;  %v277_v9 = vld [vmem:[%s399_s2 + $0x50] ss:$8 sps:$4 sm:$0xff]   ;;  %v278_v10 = vld [vmem:[%s399_s2 + $0x44] ss:$8 sps:$4 sm:$0xff]  }
   0x4   :  { %27 = vadd.xlane.f32.xlu0 %v25_v2  ;;  %176 = vmatprep.subr.bf16.mxu0 %v272_v6  ;;  %v280_v11 = vld [vmem:[%s399_s2 + $0x40] ss:$8 sps:$4 sm:$0xff]   ;;  %v281_v12 = vld [vmem:[%s399_s2 + $0x34] ss:$8 sps:$4 sm:$0xff]   ;;  %v283_v13 = vld [vmem:[%s399_s2 + $0x30] ss:$8 sps:$4 sm:$0xff]  }
   0x5   :  { %v284_v14 = vld [vmem:[%s399_s2 + $0x24] ss:$8 sps:$4 sm:$0xff]   ;;  %v286_v15 = vld [vmem:[%s399_s2 + $0x20] ss:$8 sps:$4 sm:$0xff]   ;;  %v287_v16 = vld [vmem:[%s399_s2 + $0x14] ss:$8 sps:$4 sm:$0xff]  }
   0x6   :  { %v289_v17 = vld [vmem:[%s399_s2 + $0x10] ss:$8 sps:$4 sm:$0xff]   ;;  %v290_v18 = vld [vmem:[%s399_s2 + $0x4] ss:$8 sps:$4 sm:$0xff]   ;;  %v292_v19 = vld [vmem:[%s399_s2] ss:$8 sps:$4 sm:$0xff]  }
   0x7   :  { %177 = vmatpush1.bf16.msra.mxu0 %v274_v7  ;;  %v239_v30 = vld [vmem:[%s400_s1] ss:$0 sm:$0xff]  ;;  %v79_v37 = vshrl.u32 %v78_v36, 7 }
   0x8   :  { %29 = vadd.xlane.f32.xlu0 %v26_v3  ;;  %178 = vmatprep.subr.bf16.mxu0 %v275_v8  ;;  %v76_v39 = vld [vmem:[%s401_s3] sm:$0x3] }
   0x9   :  { %v84_v38 = vsub.s32 1, %v79_v37  ;;  %v80_v53 = vsub.s32 0, %v79_v37 }
   0xb   :  { %179 = vmatpush1.bf16.msra.mxu0 %v277_v9  ;;  %v85_v40 = vrot.slane %v76_v39, %v84_v38  ;;  %v81_v54 = vrot.slane %v76_v39, %v80_v53 }
   0xc   :  { %180 = vmatprep.subr.bf16.mxu0 %v278_v10 }
   0xf   :  { %181 = vmatpush1.bf16.msra.mxu0 %v280_v11 }
  0x10   :  { %182 = vmatprep.subr.bf16.mxu0 %v281_v12 }
  0x13   :  { %183 = vmatpush1.bf16.msra.mxu0 %v283_v13 }
  0x14   :  { %184 = vmatprep.subr.bf16.mxu0 %v284_v14 }
  0x17   :  { %185 = vmatpush1.bf16.msra.mxu0 %v286_v15 }
  0x18   :  { %186 = vmatprep.subr.bf16.mxu0 %v287_v16 }
  0x1b   :  { %187 = vmatpush1.bf16.msra.mxu0 %v289_v17 }
  0x1c   :  { %188 = vmatprep.subr.bf16.mxu0 %v290_v18 }
  0x1f   :  { %189 = vmatpush1.bf16.msra.mxu0 %v292_v19 }
  0x8d   :  { %v28_v21 = vpop.xlane.xlu0 %27 }
  0x8e   :  { %v32_v22 = vmul.f32 0.0078125, %v28_v21 }
  0x90   :  { %v34_v23 = vadd.f32 1e-06, %v32_v22 }
  0x91   :  { %v30_v24 = vpop.xlane.xlu0 %29 }
  0x92   :  { %294 = vrsqrt.f32 %v34_v23  ;;  %v33_v25 = vmul.f32 0.0078125, %v30_v24 }
  0x94   :  { %v35_v26 = vadd.f32 1e-06, %v33_v25 }
  0x96   :  { %296 = vrsqrt.f32 %v35_v26 }
  0x9f   :  { %v295_v27 = vpop.eup %294 }
  0xa0   :  { %v38_v28 = vmul.f32 %v295_v27, %v22_v0 }
  0xa2   :  { %v46_v32 = vmul.f32 %v239_v30, %v38_v28 }
  0xa3   :  { %v297_v29 = vpop.eup %296 }
  0xa4   :  { %v39_v31 = vmul.f32 %v297_v29, %v23_v1 }
  0xa6   :  { %v47_v33 = vmul.f32 %v239_v30, %v39_v31 }
  0xa8   :  { %v266_v34 = vpack.c.bf16 %v47_v33, %v46_v32 }
  0xaa   :  { %267 = vst [vmem:[#allocation2] sm:$0xff] %v266_v34  }
  0xb1   :  { %v293_v35 = vld [vmem:[#allocation2] sm:$0xff]  }
  0xb2   :  { %207 = vmatmul.mubr.bf16.vlgmr.msra.gmra.mxu0 %v293_v35 }
 0x172   :  { %v208_v41 = vpop.f32.mrf.mxu0 }
 0x173   :  { %v209_v56 = vadd.f32 %v208_v41, %v81_v54 }
 0x174   :  { %v210_v42 = vpop.f32.mrf.mxu0 }
 0x175   :  { %v211_v43 = vadd.f32 %v210_v42, %v85_v40 }
 0x176   :  { %v212_v44 = vpop.f32.mrf.mxu0 }
 0x177   :  { %v259_v45 = vmul.f32 -1.442695, %v211_v43  ;;  %v213_v60 = vadd.f32 %v212_v44, %v81_v54 }
 0x178   :  { %v214_v46 = vpop.f32.mrf.mxu0 }
 0x179   :  { %298 = vpow2.f32 %v259_v45  ;;  %v215_v47 = vadd.f32 %v214_v46, %v85_v40 }
 0x17b   :  { %v260_v48 = vmul.f32 -1.442695, %v215_v47 }
 0x17d   :  { %300 = vpow2.f32 %v260_v48 }
 0x186   :  { %v299_v49 = vpop.eup %298 }
 0x187   :  { %v223_v50 = vadd.f32 1.0, %v299_v49 }
 0x189   :  { %302 = vrcp.f32 %v223_v50 }
 0x18a   :  { %v301_v51 = vpop.eup %300 }
 0x18b   :  { %v224_v52 = vadd.f32 1.0, %v301_v51 }
 0x18d   :  { %304 = vrcp.f32 %v224_v52 }
 0x196   :  { %v303_v55 = vpop.eup %302 }
 0x197   :  { %v229_v57 = vmul.f32 %v303_v55, %v211_v43 }
 0x199   :  { %v231_v58 = vmul.f32 %v229_v57, %v209_v56 }
 0x19a   :  { %v305_v59 = vpop.eup %304 }
 0x19b   :  { %233 = vst [vmem:[%s402_s4] sm:$0xff] %v231_v58  ;;  %v230_v61 = vmul.f32 %v305_v59, %v215_v47 }
 0x19d   :  { %v232_v62 = vmul.f32 %v230_v61, %v213_v60 }
 0x19f   :  { %234 = vst [vmem:[%s402_s4 + $0x8] sm:$0xff] %v232_v62 }

// kernel: sconv_lti_forward.13
= control target key start
LH: loop header
LB: loop body
LE: loop exit
PB: predicated region body
PF: predicated region fallthrough
CT: control target
= control target key end

     0   :  { %s441_s0 = inlined_call_operand.vmem [shape: f32[16,128], index: 0, kind: input, shape index: {}]   ;;  %s442_s1 = inlined_call_operand.vmem [shape: f32[1,128], index: 1, kind: input, shape index: {}]   ;;  %s443_s2 = inlined_call_operand.vmem [shape: f32[1,128], index: 2, kind: input, shape index: {}]   ;;  %s444_s3 = inlined_call_operand.vmem [shape: bf16[128,256], index: 3, kind: input, shape index: {}]   ;;  %s445_s4 = inlined_call_operand.vmem [shape: f32[1,256], index: 4, kind: input, shape index: {}]   ;;  %s446_s5 = inlined_call_operand.hbm [shape: f32[16,256], index: 5, kind: output, shape index: {}]  }
   0x1   :  { %v26_v0 = vld [vmem:[%s441_s0] sm:$0xff]  ;;  %v27_v1 = vld [vmem:[%s441_s0 + $0x8] sm:$0xff] }
   0x2   :  { %28 = vadd.xlane.f32.xlu0 %v26_v0 }
   0x6   :  { %30 = vadd.xlane.f32.xlu0 %v27_v1 }
   0x7   :  { %10 = vsyncpa [#allocation4], 0  ;;  %v290_v10 = vld [vmem:[%s444_s3 + $0x74] ss:$8 sps:$4 sm:$0xff]   ;;  %v292_v11 = vld [vmem:[%s444_s3 + $0x70] ss:$8 sps:$4 sm:$0xff]   ;;  %v99_v45 = vlaneseq }
   0x8   :  { %195 = vmatprep.subr.bf16.mxu0 %v290_v10  ;;  %v293_v12 = vld [vmem:[%s444_s3 + $0x64] ss:$8 sps:$4 sm:$0xff]   ;;  %v295_v13 = vld [vmem:[%s444_s3 + $0x60] ss:$8 sps:$4 sm:$0xff]   ;;  %v296_v14 = vld [vmem:[%s444_s3 + $0x54] ss:$8 sps:$4 sm:$0xff]  }
   0x9   :  { %196 = vmatpush1.bf16.msra.mxu0 %v292_v11  ;;  %v298_v15 = vld [vmem:[%s444_s3 + $0x50] ss:$8 sps:$4 sm:$0xff]   ;;  %v299_v16 = vld [vmem:[%s444_s3 + $0x44] ss:$8 sps:$4 sm:$0xff]   ;;  %v301_v17 = vld [vmem:[%s444_s3 + $0x40] ss:$8 sps:$4 sm:$0xff]  }
   0xa   :  { %197 = vmatprep.subr.bf16.mxu0 %v293_v12  ;;  %v302_v18 = vld [vmem:[%s444_s3 + $0x34] ss:$8 sps:$4 sm:$0xff]   ;;  %v304_v19 = vld [vmem:[%s444_s3 + $0x30] ss:$8 sps:$4 sm:$0xff]   ;;  %v305_v20 = vld [vmem:[%s444_s3 + $0x24] ss:$8 sps:$4 sm:$0xff]  }
   0xb   :  { %v307_v21 = vld [vmem:[%s444_s3 + $0x20] ss:$8 sps:$4 sm:$0xff]   ;;  %v308_v22 = vld [vmem:[%s444_s3 + $0x14] ss:$8 sps:$4 sm:$0xff]   ;;  %v310_v23 = vld [vmem:[%s444_s3 + $0x10] ss:$8 sps:$4 sm:$0xff]  }
   0xc   :  { %v311_v24 = vld [vmem:[%s444_s3 + $0x4] ss:$8 sps:$4 sm:$0xff]   ;;  %v313_v25 = vld [vmem:[%s444_s3] ss:$8 sps:$4 sm:$0xff]   ;;  %v341_v26 = vmov 0   ;;  %v100_v46 = vshrl.u32 %v99_v45, 7 }
   0xd   :  { %198 = vmatpush1.bf16.msra.mxu0 %v295_v13  ;;  %227 = vmatprep.mubr.bf16.mxu0 %v341_v26  ;;  %v258_v35 = vld [vmem:[%s442_s1] ss:$0 sm:$0xff]  ;;  %s342_s1 = smov [#allocation3]  }
   0xe   :  { %199 = vmatprep.subr.bf16.mxu0 %v296_v14  ;;  %v259_v39 = vld [vmem:[%s443_s2] ss:$0 sm:$0xff]  ;;  %v101_v47 = vsub.s32 0, %v100_v46  ;;  %v105_v49 = vsub.s32 1, %v100_v46  ;;  %s247_s2 = sshll.u32 %s342_s1, 4  ;;  %s248_s2 = int_to_ptr.vmem [resolvable:$true] %s247_s2 }
   0xf   :  { %v97_v48 = vld [vmem:[%s445_s4] sm:$0x3]  ;;  %s319_s7 = scalar_lea.vmem %s248_s2, 512  ;;  %p324_p1 = scmp.lt.s32.totalorder %s248_s2, %s248_s2 }
  0x10   :  { %v102_v50 = vrot.slane %v97_v48, %v101_v47  ;;  %v106_v51 = vrot.slane %v97_v48, %v105_v49  ;;  %p320_p0 = scmp.ne.s32.totalorder %s248_s2, %s319_s7  ;;  %p325_p2 = scmp.lt.s32.totalorder %s319_s7, %s319_s7 }
  0x11   :  { %200 = vmatpush1.bf16.msra.mxu0 %v298_v15 }
  0x12   :  { %201 = vmatprep.subr.bf16.mxu0 %v299_v16  ;;  %p326_p3 = por %p325_p2, %p324_p1 }
  0x14   :  { %p327_p4 = pnand %p326_p3, %p320_p0 }
  0x15   :  { %202 = vmatpush1.bf16.msra.mxu0 %v301_v17 }
  0x16   :  { %203 = vmatprep.subr.bf16.mxu0 %v302_v18 }
  0x19   :  { %204 = vmatpush1.bf16.msra.mxu0 %v304_v19 }
  0x1a   :  { %205 = vmatprep.subr.bf16.mxu0 %v305_v20 }
  0x1d   :  { %206 = vmatpush1.bf16.msra.mxu0 %v307_v21 }
  0x1e   :  { %207 = vmatprep.subr.bf16.mxu0 %v308_v22 }
  0x21   :  { %208 = vmatpush1.bf16.msra.mxu0 %v310_v23 }
  0x22   :  { %209 = vmatprep.subr.bf16.mxu0 %v311_v24 }
  0x25   :  { %210 = vmatpush1.bf16.msra.mxu0 %v313_v25 }
  0x8b   :  { %v29_v2 = vpop.xlane.xlu0 %28 }
  0x8c   :  { %v33_v3 = vmul.f32 0.0078125, %v29_v2 }
  0x8e   :  { %v35_v4 = vsub.f32 %v26_v0, %v33_v3 }
  0x8f   :  { %v31_v5 = vpop.xlane.xlu0 %30 }
  0x90   :  { %v34_v6 = vmul.f32 0.0078125, %v31_v5  ;;  %v37_v7 = vmul.f32 %v35_v4, %v35_v4 }
  0x92   :  { %v36_v8 = vsub.f32 %v27_v1, %v34_v6  ;;  %39 = vadd.xlane.f32.xlu1 %v37_v7 }
  0x94   :  { %v38_v9 = vmul.f32 %v36_v8, %v36_v8 }
  0x96   :  { %41 = vadd.xlane.f32.xlu1 %v38_v9 }
 0x11b   :  { %v40_v27 = vpop.xlane.xlu1 %39 }
 0x11c   :  { %v43_v28 = vmul.f32 0.0078125, %v40_v27 }
 0x11e   :  { %v45_v29 = vadd.f32 1e-05, %v43_v28 }
 0x11f   :  { %v42_v30 = vpop.xlane.xlu1 %41 }
 0x120   :  { %315 = vrsqrt.f32 %v45_v29  ;;  %v44_v31 = vmul.f32 0.0078125, %v42_v30 }
 0x122   :  { %v46_v32 = vadd.f32 1e-05, %v44_v31 }
 0x124   :  { %317 = vrsqrt.f32 %v46_v32 }
 0x12d   :  { %v316_v33 = vpop.eup %315 }
 0x12e   :  { %v49_v34 = vmul.f32 %v316_v33, %v35_v4 }
 0x130   :  { %v58_v37 = vmul.f32 %v258_v35, %v49_v34 }
 0x131   :  { %v318_v36 = vpop.eup %317 }
 0x132   :  { %v50_v38 = vmul.f32 %v318_v36, %v36_v8  ;;  %v67_v41 = vadd.f32 %v259_v39, %v58_v37 }
 0x134   :  { %v59_v40 = vmul.f32 %v258_v35, %v50_v38 }
 0x136   :  { %v68_v42 = vadd.f32 %v259_v39, %v59_v40 }
 0x138   :  { %v284_v43 = vpack.c.bf16 %v68_v42, %v67_v41 }
 0x13a   :  { %285 = vst [vmem:[#allocation2] sm:$0xff] %v284_v43  }
 0x141   :  { %v314_v44 = vld [vmem:[#allocation2] sm:$0xff]  }
 0x142   :  { %228 = vmatmul.mubr.bf16.vlgmr.msra.gmra.mxu0 %v314_v44 }
 0x202   :  { %v229_v52 = vpop.f32.mrf.mxu0 }
 0x203   :  { %v230_v53 = vadd.f32 %v229_v52, %v102_v50 }
 0x204   :  { %v231_v54 = vpop.f32.mrf.mxu0 }
 0x205   :  { %238 = vst [vmem:[#allocation3] sm:$0xff] %v230_v53  ;;  %v232_v55 = vadd.f32 %v231_v54, %v106_v51 }
 0x206   :  { %v233_v56 = vpop.f32.mrf.mxu0 }
 0x207   :  { %239 = vst [vmem:[#allocation3 + $0x8] sm:$0xff] %v232_v55  ;;  %v234_v57 = vadd.f32 %v233_v56, %v102_v50 }
 0x208   :  { %v235_v58 = vpop.f32.mrf.mxu0 }
 0x209   :  { %240 = vst [vmem:[#allocation3 + $0x10] sm:$0xff] %v234_v57  ;;  %v236_v59 = vadd.f32 %v235_v58, %v106_v51 }
 0x20b   :  { %241 = vst [vmem:[#allocation3 + $0x18] sm:$0xff] %v236_v59 }
 0x20c   :  { %330 = shalt.err (!%p327_p4)
}
 0x20d   :  { %s343_s4 = smov 256   ;;  %s344_s8 = smov 16  }
 0x20e   :  { %253 = dma.vmem_to_hbm [thread:$0]  %s248_s2, 512, %s446_s5, [#allocation4], %s343_s4, %s343_s4, %s344_s8  }
 0x20f   :  { %339 = dma.done.wait [#allocation4], 512  }
 0x210   :  { %340 = vsyncadd [#allocation4], 4294966784 }
 0x211   :  { %257 = vsyncpa [#allocation4], 1 }

// kernel: sconv_lti_forward.8
= control target key start
LH: loop header
LB: loop body
LE: loop exit
PB: predicated region body
PF: predicated region fallthrough
CT: control target
= control target key end

     0   :  { %v451_v3 = vmov 0.0   ;;  %vm452_vm0 = vmmov 0   ;;  %s595_s1 = inlined_call_operand.vmem [shape: f32[16,128], index: 1, kind: input, shape index: {}]   ;;  %s596_s0 = inlined_call_operand.vmem [shape: bf16[16,128], index: 0, kind: input, shape index: {}]   ;;  %s597_s6 = inlined_call_operand.vmem [shape: bf16[128,128], index: 6, kind: input, shape index: {}]   ;;  %s598_s4 = inlined_call_operand.vmem [shape: bf16[128,128], index: 4, kind: input, shape index: {}]   ;;  %s599_s2 = inlined_call_operand.vmem [shape: f32[1,128], index: 2, kind: input, shape index: {}]   ;;  %s600_s3 = inlined_call_operand.vmem [shape: f32[1,128], index: 3, kind: input, shape index: {}]   ;;  %s601_s7 = inlined_call_operand.vmem [shape: f32[1,128], index: 7, kind: input, shape index: {}]   ;;  %s602_s5 = inlined_call_operand.vmem [shape: f32[1,128], index: 5, kind: input, shape index: {}]   ;;  %s603_s8 = inlined_call_operand.vmem [shape: f32[16,128], index: 8, kind: output, shape index: {}]  }
   0x1   :  { %v501_v0 = vld [vmem:[%s595_s1] sm:$0xff]  ;;  %v506_v1 = vld [vmem:[%s595_s1 + $0x8] sm:$0xff]  ;;  %397 = vmatprep.subr.bf16.mxu1 %v451_v3  ;;  %377 = vmatprep.subr.bf16.mxu0 %v451_v3  ;;  %v419_v7 = vld [vmem:[%s597_s6 + $0x38] sm:$0xff]  }
   0x2   :  { %v356_v2 = vld [vmem:[%s596_s0] sm:$0xff]   ;;  %v33_v4 = vmul.f32 %v501_v0, %v501_v0  ;;  %v34_v8 = vmul.f32 %v506_v1, %v506_v1  ;;  %398 = vmatpush3.bf16.msra.mxu1 %v419_v7  ;;  %v420_v11 = vld [vmem:[%s597_s6 + $0x30] sm:$0xff]   ;;  %v421_v12 = vld [vmem:[%s597_s6 + $0x28] sm:$0xff]   ;;  %413 = vmatprep.mubr.msk.bf16.mxu1 %vm452_vm0, %v451_v3 }
   0x3   :  { %v513_v5 = vunpack.c.l.bf16 %v356_v2  ;;  %v515_v6 = vunpack.c.h.bf16 %v356_v2  ;;  %399 = vmatprep.subr.bf16.mxu1 %v451_v3  ;;  %v422_v13 = vld [vmem:[%s597_s6 + $0x20] sm:$0xff]   ;;  %v423_v14 = vld [vmem:[%s597_s6 + $0x18] sm:$0xff]   ;;  %393 = vmatprep.mubr.msk.bf16.mxu0 %vm452_vm0, %v451_v3  ;;  %v424_v16 = vld [vmem:[%s597_s6 + $0x10] sm:$0xff]  }
   0x4   :  { %35 = vadd.xlane.f32.xlu0 %v33_v4  ;;  %v425_v15 = vld [vmem:[%s598_s4 + $0x38] sm:$0xff]   ;;  %v427_v17 = vld [vmem:[%s598_s4 + $0x30] sm:$0xff]   ;;  %v426_v18 = vld [vmem:[%s597_s6 + $0x8] sm:$0xff]  }
   0x5   :  { %v62_v9 = vmul.f32 %v513_v5, %v513_v5  ;;  %v63_v10 = vmul.f32 %v515_v6, %v515_v6  ;;  %378 = vmatpush3.bf16.msra.mxu0 %v425_v15  ;;  %v428_v19 = vld [vmem:[%s597_s6] sm:$0xff]   ;;  %v429_v20 = vld [vmem:[%s598_s4 + $0x28] sm:$0xff]   ;;  %v431_v22 = vld [vmem:[%s598_s4 + $0x18] sm:$0xff]  }
   0x6   :  { %400 = vmatpush3.bf16.msra.mxu1 %v420_v11  ;;  %379 = vmatprep.subr.bf16.mxu0 %v451_v3  ;;  %v430_v21 = vld [vmem:[%s598_s4 + $0x20] sm:$0xff]   ;;  %v432_v23 = vld [vmem:[%s598_s4 + $0x10] sm:$0xff]   ;;  %v433_v24 = vld [vmem:[%s598_s4 + $0x8] sm:$0xff]  }
   0x7   :  { %64 = vadd.xlane.f32.xlu1 %v62_v9  ;;  %401 = vmatprep.subr.bf16.mxu1 %v451_v3  ;;  %v434_v25 = vld [vmem:[%s598_s4] sm:$0xff]  }
   0x8   :  { %37 = vadd.xlane.f32.xlu0 %v34_v8  ;;  %v333_v43 = vld [vmem:[%s599_s2] ss:$0 sm:$0xff] }
   0x9   :  { %380 = vmatpush3.bf16.msra.mxu0 %v427_v17  ;;  %v334_v44 = vld [vmem:[%s600_s3] ss:$0 sm:$0xff] }
   0xa   :  { %402 = vmatpush3.bf16.msra.mxu1 %v421_v12  ;;  %381 = vmatprep.subr.bf16.mxu0 %v451_v3  ;;  %v344_v54 = vld [vmem:[%s601_s7] ss:$0 sm:$0xff] }
   0xb   :  { %66 = vadd.xlane.f32.xlu1 %v63_v10  ;;  %403 = vmatprep.subr.bf16.mxu1 %v451_v3  ;;  %v335_v9 = vld [vmem:[%s602_s5] ss:$0 sm:$0xff] }
   0xd   :  { %382 = vmatpush3.bf16.msra.mxu0 %v429_v20 }
   0xe   :  { %404 = vmatpush3.bf16.msra.mxu1 %v422_v13  ;;  %383 = vmatprep.subr.bf16.mxu0 %v451_v3 }
   0xf   :  { %405 = vmatprep.subr.bf16.mxu1 %v451_v3 }
  0x11   :  { %384 = vmatpush3.bf16.msra.mxu0 %v430_v21 }
  0x12   :  { %406 = vmatpush3.bf16.msra.mxu1 %v423_v14  ;;  %385 = vmatprep.subr.bf16.mxu0 %v451_v3 }
  0x13   :  { %407 = vmatprep.subr.bf16.mxu1 %v451_v3 }
  0x15   :  { %386 = vmatpush3.bf16.msra.mxu0 %v431_v22 }
  0x16   :  { %408 = vmatpush3.bf16.msra.mxu1 %v424_v16  ;;  %387 = vmatprep.subr.bf16.mxu0 %v451_v3 }
  0x17   :  { %409 = vmatprep.subr.bf16.mxu1 %v451_v3 }
  0x19   :  { %388 = vmatpush3.bf16.msra.mxu0 %v432_v23 }
  0x1a   :  { %410 = vmatpush3.bf16.msra.mxu1 %v426_v18  ;;  %389 = vmatprep.subr.bf16.mxu0 %v451_v3 }
  0x1b   :  { %411 = vmatprep.subr.bf16.mxu1 %v451_v3 }
  0x1d   :  { %390 = vmatpush3.bf16.msra.mxu0 %v433_v24 }
  0x1e   :  { %412 = vmatpush3.bf16.msra.mxu1 %v428_v19  ;;  %391 = vmatprep.subr.bf16.mxu0 %v451_v3 }
  0x21   :  { %392 = vmatpush3.bf16.msra.mxu0 %v434_v25 }
  0x8d   :  { %v36_v26 = vpop.xlane.xlu0 %35 }
  0x8e   :  { %v40_v27 = vmul.f32 0.0078125, %v36_v26 }
  0x90   :  { %v65_v28 = vpop.xlane.xlu1 %64  ;;  %v42_v29 = vadd.f32 1e-06, %v40_v27 }
  0x91   :  { %v68_v30 = vmul.f32 0.0078125, %v65_v28  ;;  %v38_v31 = vpop.xlane.xlu0 %37 }
  0x92   :  { %435 = vrsqrt.f32 %v42_v29  ;;  %v41_v32 = vmul.f32 0.0078125, %v38_v31 }
  0x93   :  { %v70_v33 = vadd.f32 1e-06, %v68_v30 }
  0x94   :  { %v67_v34 = vpop.xlane.xlu1 %66  ;;  %v43_v35 = vadd.f32 1e-06, %v41_v32 }
  0x95   :  { %437 = vrsqrt.f32 %v70_v33  ;;  %v69_v36 = vmul.f32 0.0078125, %v67_v34 }
  0x96   :  { %439 = vrsqrt.f32 %v43_v35 }
  0x97   :  { %v71_v37 = vadd.f32 1e-06, %v69_v36 }
  0x99   :  { %441 = vrsqrt.f32 %v71_v37 }
  0x9f   :  { %v436_v38 = vpop.eup %435 }
  0xa0   :  { %v46_v40 = vmul.f32 %v436_v38, %v501_v0 }
  0xa2   :  { %v438_v39 = vpop.eup %437  ;;  %v54_v47 = vmul.f32 %v333_v43, %v46_v40 }
  0xa3   :  { %v74_v41 = vmul.f32 %v438_v39, %v513_v5  ;;  %v440_v42 = vpop.eup %439 }
  0xa4   :  { %v47_v45 = vmul.f32 %v440_v42, %v506_v1 }
  0xa5   :  { %v82_v50 = vmul.f32 %v334_v44, %v74_v41 }
  0xa6   :  { %v442_v46 = vpop.eup %441  ;;  %v55_v48 = vmul.f32 %v333_v43, %v47_v45 }
  0xa7   :  { %v75_v49 = vmul.f32 %v442_v46, %v515_v6 }
  0xa8   :  { %v56_v51 = vpack.c.bf16 %v55_v48, %v54_v47 }
  0xa9   :  { %v83_v52 = vmul.f32 %v334_v44, %v75_v49 }
  0xaa   :  { %414 = vmatmul.mubr.bf16.vlgmr.msra.gmra.mxu1 %v56_v51 }
  0xab   :  { %v84_v53 = vpack.c.bf16 %v83_v52, %v82_v50 }
  0xad   :  { %394 = vmatmul.mubr.bf16.vlgmr.msra.gmra.mxu0 %v84_v53 }
 0x16a   :  { %v302_v55 = vpop.f32.mrf.mxu1 }
 0x16b   :  { %v303_v56 = vadd.f32 %v344_v54, %v302_v55 }
 0x16c   :  { %v415_v57 = vpop.f32.mrf.mxu1 }
 0x16d   :  { %v190_v58 = vpop.f32.mrf.mxu0  ;;  %v353_v59 = vmul.f32 -1.442695, %v303_v56 }
 0x16e   :  { %v305_v60 = vpop.f32.mrf.mxu1  ;;  %v191_v12 = vadd.f32 %v335_v9, %v190_v58 }
 0x16f   :  { %v395_v61 = vpop.f32.mrf.mxu0  ;;  %443 = vpow2.f32 %v353_v59  ;;  %v306_v62 = vadd.f32 %v344_v54, %v305_v60 }
 0x170   :  { %v416_v63 = vpop.f32.mrf.mxu1 }
 0x171   :  { %v193_v2 = vpop.f32.mrf.mxu0  ;;  %v354_v3 = vmul.f32 -1.442695, %v306_v62 }
 0x172   :  { %v194_v17 = vadd.f32 %v335_v9, %v193_v2 }
 0x173   :  { %v396_v4 = vpop.f32.mrf.mxu0  ;;  %445 = vpow2.f32 %v354_v3 }
 0x17c   :  { %v444_v5 = vpop.eup %443 }
 0x17d   :  { %v315_v6 = vadd.f32 1.0, %v444_v5 }
 0x17f   :  { %447 = vrcp.f32 %v315_v6 }
 0x180   :  { %v446_v7 = vpop.eup %445 }
 0x181   :  { %v316_v8 = vadd.f32 1.0, %v446_v7 }
 0x183   :  { %449 = vrcp.f32 %v316_v8 }
 0x18c   :  { %v448_v10 = vpop.eup %447 }
 0x18d   :  { %v321_v11 = vmul.f32 %v448_v10, %v303_v56 }
 0x18f   :  { %v323_v13 = vmul.f32 %v321_v11, %v191_v12 }
 0x190   :  { %v450_v14 = vpop.eup %449 }
 0x191   :  { %v322_v15 = vmul.f32 %v450_v14, %v306_v62  ;;  %v325_v16 = vadd.f32 %v323_v13, %v501_v0 }
 0x193   :  { %327 = vst [vmem:[%s603_s8] sm:$0xff] %v325_v16  ;;  %v324_v18 = vmul.f32 %v322_v15, %v194_v17 }
 0x195   :  { %v326_v19 = vadd.f32 %v324_v18, %v506_v1 }
 0x197   :  { %328 = vst [vmem:[%s603_s8 + $0x8] sm:$0xff] %v326_v19 }

// kernel: sconv_lti_forward.9
= control target key start
LH: loop header
LB: loop body
LE: loop exit
PB: predicated region body
PF: predicated region fallthrough
CT: control target
= control target key end

     0   :  { %v775_v36 = vmov 0   ;;  %s988_s0 = inlined_call_operand.vmem [shape: f32[16,128], index: 0, kind: input, shape index: {}]   ;;  %s989_s2 = inlined_call_operand.vmem [shape: bf16[128,512], index: 2, kind: input, shape index: {}]   ;;  %s990_s1 = inlined_call_operand.vmem [shape: f32[1,128], index: 1, kind: input, shape index: {}]   ;;  %s991_s4 = inlined_call_operand.vmem [shape: bf16[256,128], index: 4, kind: input, shape index: {}]   ;;  %s992_s3 = inlined_call_operand.vmem [shape: f32[1,512], index: 3, kind: input, shape index: {}]   ;;  %s993_s5 = inlined_call_operand.vmem [shape: f32[1,128], index: 5, kind: input, shape index: {}]   ;;  %s994_s6 = inlined_call_operand.vmem [shape: f32[16,128], index: 6, kind: output, shape index: {}]  }
   0x1   :  { %v814_v0 = vld [vmem:[%s988_s0] sm:$0xff]  ;;  %v819_v1 = vld [vmem:[%s988_s0 + $0x8] sm:$0xff]  ;;  %320 = vmatprep.mubr.bf16.mxu0 %v775_v36  ;;  %363 = vmatprep.mubr.bf16.mxu1 %v775_v36  ;;  %v739_v52 = vld [vmem:[%s991_s4 + $0x78] sm:$0xff]  }
   0x2   :  { %v31_v2 = vmul.f32 %v814_v0, %v814_v0  ;;  %v32_v3 = vmul.f32 %v819_v1, %v819_v1  ;;  %v690_v4 = vld [vmem:[%s989_s2 + $0xe4] ss:$16 sps:$4 sm:$0xff]   ;;  %v692_v5 = vld [vmem:[%s989_s2 + $0xec] ss:$16 sps:$4 sm:$0xff]   ;;  %v694_v6 = vld [vmem:[%s989_s2 + $0xe0] ss:$16 sps:$4 sm:$0xff]  }
   0x3   :  { %288 = vmatprep.subr.bf16.mxu0 %v690_v4  ;;  %v695_v7 = vld [vmem:[%s989_s2 + $0xe8] ss:$16 sps:$4 sm:$0xff]   ;;  %331 = vmatprep.subr.bf16.mxu1 %v692_v5  ;;  %v696_v8 = vld [vmem:[%s989_s2 + $0xc4] ss:$16 sps:$4 sm:$0xff]   ;;  %v698_v9 = vld [vmem:[%s989_s2 + $0xcc] ss:$16 sps:$4 sm:$0xff]  }
   0x4   :  { %33 = vadd.xlane.f32.xlu0 %v31_v2  ;;  %289 = vmatpush1.bf16.msra.mxu0 %v694_v6  ;;  %v700_v10 = vld [vmem:[%s989_s2 + $0xc0] ss:$16 sps:$4 sm:$0xff]   ;;  %v701_v11 = vld [vmem:[%s989_s2 + $0xc8] ss:$16 sps:$4 sm:$0xff]   ;;  %v702_v12 = vld [vmem:[%s989_s2 + $0xa4] ss:$16 sps:$4 sm:$0xff]   ;;  %v102_v6 = vlaneseq }
   0x5   :  { %332 = vmatpush1.bf16.msra.mxu1 %v695_v7  ;;  %290 = vmatprep.subr.bf16.mxu0 %v696_v8  ;;  %v704_v13 = vld [vmem:[%s989_s2 + $0xac] ss:$16 sps:$4 sm:$0xff]   ;;  %v706_v14 = vld [vmem:[%s989_s2 + $0xa0] ss:$16 sps:$4 sm:$0xff]   ;;  %v707_v15 = vld [vmem:[%s989_s2 + $0xa8] ss:$16 sps:$4 sm:$0xff]  }
   0x6   :  { %333 = vmatprep.subr.bf16.mxu1 %v698_v9  ;;  %v708_v16 = vld [vmem:[%s989_s2 + $0x84] ss:$16 sps:$4 sm:$0xff]   ;;  %v710_v17 = vld [vmem:[%s989_s2 + $0x8c] ss:$16 sps:$4 sm:$0xff]   ;;  %v712_v18 = vld [vmem:[%s989_s2 + $0x80] ss:$16 sps:$4 sm:$0xff]  }
   0x7   :  { %v713_v19 = vld [vmem:[%s989_s2 + $0x88] ss:$16 sps:$4 sm:$0xff]   ;;  %v714_v20 = vld [vmem:[%s989_s2 + $0x64] ss:$16 sps:$4 sm:$0xff]   ;;  %v716_v21 = vld [vmem:[%s989_s2 + $0x6c] ss:$16 sps:$4 sm:$0xff]  }
   0x8   :  { %35 = vadd.xlane.f32.xlu0 %v32_v3  ;;  %291 = vmatpush1.bf16.msra.mxu0 %v700_v10  ;;  %v718_v22 = vld [vmem:[%s989_s2 + $0x60] ss:$16 sps:$4 sm:$0xff]   ;;  %v719_v23 = vld [vmem:[%s989_s2 + $0x68] ss:$16 sps:$4 sm:$0xff]   ;;  %v720_v24 = vld [vmem:[%s989_s2 + $0x44] ss:$16 sps:$4 sm:$0xff]  }
   0x9   :  { %334 = vmatpush1.bf16.msra.mxu1 %v701_v11  ;;  %292 = vmatprep.subr.bf16.mxu0 %v702_v12  ;;  %v722_v25 = vld [vmem:[%s989_s2 + $0x4c] ss:$16 sps:$4 sm:$0xff]   ;;  %v724_v26 = vld [vmem:[%s989_s2 + $0x40] ss:$16 sps:$4 sm:$0xff]   ;;  %v725_v27 = vld [vmem:[%s989_s2 + $0x48] ss:$16 sps:$4 sm:$0xff]  }
   0xa   :  { %335 = vmatprep.subr.bf16.mxu1 %v704_v13  ;;  %v726_v28 = vld [vmem:[%s989_s2 + $0x24] ss:$16 sps:$4 sm:$0xff]   ;;  %v728_v29 = vld [vmem:[%s989_s2 + $0x2c] ss:$16 sps:$4 sm:$0xff]   ;;  %v730_v30 = vld [vmem:[%s989_s2 + $0x20] ss:$16 sps:$4 sm:$0xff]  }
   0xb   :  { %v731_v31 = vld [vmem:[%s989_s2 + $0x28] ss:$16 sps:$4 sm:$0xff]   ;;  %v732_v32 = vld [vmem:[%s989_s2 + $0x4] ss:$16 sps:$4 sm:$0xff]   ;;  %v734_v33 = vld [vmem:[%s989_s2 + $0xc] ss:$16 sps:$4 sm:$0xff]  }
   0xc   :  { %293 = vmatpush1.bf16.msra.mxu0 %v706_v14  ;;  %v736_v34 = vld [vmem:[%s989_s2] ss:$16 sps:$4 sm:$0xff]   ;;  %v737_v35 = vld [vmem:[%s989_s2 + $0x8] ss:$16 sps:$4 sm:$0xff]   ;;  %v103_v7 = vshrl.u32 %v102_v6, 7 }
   0xd   :  { %336 = vmatpush1.bf16.msra.mxu1 %v707_v15  ;;  %294 = vmatprep.subr.bf16.mxu0 %v708_v16  ;;  %v603_v46 = vld [vmem:[%s990_s1] ss:$0 sm:$0xff]  ;;  %v740_v53 = vld [vmem:[%s991_s4 + $0x38] sm:$0xff]   ;;  %v741_v54 = vld [vmem:[%s991_s4 + $0x70] sm:$0xff]  }
   0xe   :  { %337 = vmatprep.subr.bf16.mxu1 %v710_v17  ;;  %v742_v55 = vld [vmem:[%s991_s4 + $0x30] sm:$0xff]   ;;  %v743_v56 = vld [vmem:[%s991_s4 + $0x68] sm:$0xff]   ;;  %v745_v58 = vld [vmem:[%s991_s4 + $0x60] sm:$0xff]   ;;  %v112_v8 = vsub.s32 2, %v103_v7  ;;  %v116_v10 = vsub.s32 3, %v103_v7  ;;  %v104_v36 = vsub.s32 0, %v103_v7 }
   0xf   :  { %v744_v57 = vld [vmem:[%s991_s4 + $0x28] sm:$0xff]   ;;  %v746_v59 = vld [vmem:[%s991_s4 + $0x20] sm:$0xff]   ;;  %v747_v60 = vld [vmem:[%s991_s4 + $0x58] sm:$0xff]  }
  0x10   :  { %295 = vmatpush1.bf16.msra.mxu0 %v712_v18  ;;  %v748_v61 = vld [vmem:[%s991_s4 + $0x18] sm:$0xff]   ;;  %v749_v62 = vld [vmem:[%s991_s4 + $0x50] sm:$0xff]   ;;  %v751_v2 = vld [vmem:[%s991_s4 + $0x48] sm:$0xff]  }
  0x11   :  { %338 = vmatpush1.bf16.msra.mxu1 %v713_v19  ;;  %296 = vmatprep.subr.bf16.mxu0 %v714_v20  ;;  %v750_v63 = vld [vmem:[%s991_s4 + $0x10] sm:$0xff]   ;;  %v752_v3 = vld [vmem:[%s991_s4 + $0x8] sm:$0xff]   ;;  %v753_v4 = vld [vmem:[%s991_s4 + $0x40] sm:$0xff]  }
  0x12   :  { %339 = vmatprep.subr.bf16.mxu1 %v716_v21  ;;  %v754_v5 = vld [vmem:[%s991_s4] sm:$0xff]  }
  0x13   :  { %v100_v9 = vld [vmem:[%s992_s3] sm:$0xf] }
  0x14   :  { %297 = vmatpush1.bf16.msra.mxu0 %v718_v22  ;;  %v113_v11 = vrot.slane %v100_v9, %v112_v8  ;;  %v117_v12 = vrot.slane %v100_v9, %v116_v10 }
  0x15   :  { %340 = vmatpush1.bf16.msra.mxu1 %v719_v23  ;;  %298 = vmatprep.subr.bf16.mxu0 %v720_v24 }
  0x16   :  { %341 = vmatprep.subr.bf16.mxu1 %v722_v25 }
  0x18   :  { %299 = vmatpush1.bf16.msra.mxu0 %v724_v26 }
  0x19   :  { %342 = vmatpush1.bf16.msra.mxu1 %v725_v27  ;;  %300 = vmatprep.subr.bf16.mxu0 %v726_v28 }
  0x1a   :  { %343 = vmatprep.subr.bf16.mxu1 %v728_v29 }
  0x1c   :  { %301 = vmatpush1.bf16.msra.mxu0 %v730_v30 }
  0x1d   :  { %344 = vmatpush1.bf16.msra.mxu1 %v731_v31  ;;  %302 = vmatprep.subr.bf16.mxu0 %v732_v32 }
  0x1e   :  { %345 = vmatprep.subr.bf16.mxu1 %v734_v33 }
  0x20   :  { %303 = vmatpush1.bf16.msra.mxu0 %v736_v34 }
  0x21   :  { %346 = vmatpush1.bf16.msra.mxu1 %v737_v35  ;;  %667 = vmatprep.subr.bf16.mxu0 %v739_v52  ;;  %v108_v35 = vsub.s32 1, %v103_v7 }
  0x8d   :  { %v34_v37 = vpop.xlane.xlu0 %33 }
  0x8e   :  { %v38_v38 = vmul.f32 0.0078125, %v34_v37 }
  0x90   :  { %v40_v39 = vadd.f32 1e-06, %v38_v38 }
  0x91   :  { %v36_v40 = vpop.xlane.xlu0 %35 }
  0x92   :  { %755 = vrsqrt.f32 %v40_v39  ;;  %v39_v41 = vmul.f32 0.0078125, %v36_v40  ;;  %v109_v40 = vrot.slane %v100_v9, %v108_v35 }
  0x94   :  { %v41_v42 = vadd.f32 1e-06, %v39_v41 }
  0x96   :  { %757 = vrsqrt.f32 %v41_v42  ;;  %v105_v42 = vrot.slane %v100_v9, %v104_v36 }
  0x9f   :  { %v756_v43 = vpop.eup %755 }
  0xa0   :  { %v44_v44 = vmul.f32 %v756_v43, %v814_v0 }
  0xa2   :  { %v52_v48 = vmul.f32 %v603_v46, %v44_v44 }
  0xa3   :  { %v758_v45 = vpop.eup %757 }
  0xa4   :  { %v45_v47 = vmul.f32 %v758_v45, %v819_v1 }
  0xa6   :  { %v53_v49 = vmul.f32 %v603_v46, %v45_v47 }
  0xa8   :  { %v665_v50 = vpack.c.bf16 %v53_v49, %v52_v48 }
  0xaa   :  { %666 = vst [vmem:[#allocation2] sm:$0xff] %v665_v50  }
  0xb1   :  { %v738_v51 = vld [vmem:[#allocation2] sm:$0xff]  }
  0xb2   :  { %321 = vmatmul.mubr.bf16.vlgmr.msra.gmra.mxu0 %v738_v51  ;;  %364 = vmatmul.mubr.bf16.vlgmr.msra.gmra.mxu1 %v738_v51 }
  0xb3   :  { %668 = vmatpush3.bf16.msra.mxu0 %v740_v53 }
  0xb4   :  { %669 = vmatprep.subr.bf16.mxu0 %v741_v54 }
  0xb7   :  { %670 = vmatpush3.bf16.msra.mxu0 %v742_v55 }
  0xb8   :  { %671 = vmatprep.subr.bf16.mxu0 %v743_v56 }
  0xbb   :  { %672 = vmatpush3.bf16.msra.mxu0 %v744_v57 }
  0xbc   :  { %673 = vmatprep.subr.bf16.mxu0 %v745_v58 }
  0xbf   :  { %674 = vmatpush3.bf16.msra.mxu0 %v746_v59 }
  0xc0   :  { %675 = vmatprep.subr.bf16.mxu0 %v747_v60 }
  0xc3   :  { %676 = vmatpush3.bf16.msra.mxu0 %v748_v61 }
  0xc4   :  { %677 = vmatprep.subr.bf16.mxu0 %v749_v62  ;;  %v659_v62 = vld [vmem:[%s993_s5] ss:$0 sm:$0xff] }
  0xc7   :  { %678 = vmatpush3.bf16.msra.mxu0 %v750_v63 }
  0xc8   :  { %679 = vmatprep.subr.bf16.mxu0 %v751_v2 }
  0xcb   :  { %680 = vmatpush3.bf16.msra.mxu0 %v752_v3 }
  0xcc   :  { %681 = vmatprep.subr.bf16.mxu0 %v753_v4 }
  0xcf   :  { %682 = vmatpush3.bf16.msra.mxu0 %v754_v5 }
 0x172   :  { %v365_v13 = vpop.f32.mrf.mxu1  ;;  %v322_v33 = vpop.f32.mrf.mxu0 }
 0x173   :  { %v366_v14 = vadd.f32 %v365_v13, %v113_v11  ;;  %v323_v52 = vadd.f32 %v322_v33, %v105_v42 }
 0x174   :  { %v367_v15 = vpop.f32.mrf.mxu1  ;;  %v324_v34 = vpop.f32.mrf.mxu0 }
 0x175   :  { %v639_v16 = vmul.f32 -1.442695, %v366_v14  ;;  %v368_v17 = vadd.f32 %v367_v15, %v117_v12  ;;  %v325_v49 = vadd.f32 %v324_v34, %v109_v40 }
 0x176   :  { %v369_v18 = vpop.f32.mrf.mxu1  ;;  %v326_v37 = vpop.f32.mrf.mxu0 }
 0x177   :  { %759 = vpow2.f32 %v639_v16  ;;  %v640_v19 = vmul.f32 -1.442695, %v368_v17  ;;  %v370_v20 = vadd.f32 %v369_v18, %v113_v11  ;;  %v327_v48 = vadd.f32 %v326_v37, %v105_v42 }
 0x178   :  { %v371_v21 = vpop.f32.mrf.mxu1  ;;  %v328_v43 = vpop.f32.mrf.mxu0 }
 0x179   :  { %761 = vpow2.f32 %v640_v19  ;;  %v641_v22 = vmul.f32 -1.442695, %v370_v20  ;;  %v372_v23 = vadd.f32 %v371_v21, %v117_v12  ;;  %v329_v50 = vadd.f32 %v328_v43, %v109_v40 }
 0x17b   :  { %763 = vpow2.f32 %v641_v22  ;;  %v642_v24 = vmul.f32 -1.442695, %v372_v23 }
 0x17d   :  { %765 = vpow2.f32 %v642_v24 }
 0x184   :  { %v760_v25 = vpop.eup %759 }
 0x185   :  { %v386_v27 = vadd.f32 1.0, %v760_v25 }
 0x186   :  { %v762_v26 = vpop.eup %761 }
 0x187   :  { %v387_v28 = vadd.f32 1.0, %v762_v26 }
 0x188   :  { %v764_v29 = vpop.eup %763 }
 0x189   :  { %767 = vrcp.f32 %v387_v28  ;;  %v388_v30 = vadd.f32 1.0, %v764_v29 }
 0x18a   :  { %v766_v31 = vpop.eup %765  ;;  %769 = vrcp.f32 %v386_v27 }
 0x18b   :  { %771 = vrcp.f32 %v388_v30  ;;  %v389_v32 = vadd.f32 1.0, %v766_v31 }
 0x18d   :  { %773 = vrcp.f32 %v389_v32 }
 0x196   :  { %v768_v38 = vpop.eup %767 }
 0x197   :  { %v770_v39 = vpop.eup %769  ;;  %v399_v44 = vmul.f32 %v768_v38, %v368_v17 }
 0x198   :  { %v772_v41 = vpop.eup %771  ;;  %v398_v47 = vmul.f32 %v770_v39, %v366_v14 }
 0x199   :  { %v400_v45 = vmul.f32 %v772_v41, %v370_v20  ;;  %v403_v54 = vmul.f32 %v399_v44, %v325_v49 }
 0x19a   :  { %v774_v46 = vpop.eup %773  ;;  %v402_v56 = vmul.f32 %v398_v47, %v323_v52 }
 0x19b   :  { %v401_v51 = vmul.f32 %v774_v46, %v372_v23  ;;  %v404_v53 = vmul.f32 %v400_v45, %v327_v48 }
 0x19d   :  { %v405_v55 = vmul.f32 %v401_v51, %v329_v50  ;;  %v406_v58 = vpack.c.bf16 %v404_v53, %v402_v56 }
 0x19f   :  { %v407_v57 = vpack.c.bf16 %v405_v55, %v403_v54 }
 0x1a1   :  { %570 = vmatprep.mubr.bf16.mxu0 %v407_v57 }
 0x1a2   :  { %571 = vmatmul.mubr.bf16.vlgmr.msra.gmra.mxu0 %v406_v58 }
 0x262   :  { %v683_v59 = vpop.f32.mrf.mxu0 }
 0x264   :  { %v684_v60 = vpop.f32.mrf.mxu0 }
 0x265   :  { %v685_v61 = vadd.f32 %v684_v60, %v683_v59 }
 0x266   :  { %v686_v63 = vpop.f32.mrf.mxu0 }
 0x267   :  { %v579_v2 = vadd.f32 %v685_v61, %v814_v0 }
 0x268   :  { %v687_v3 = vpop.f32.mrf.mxu0 }
 0x269   :  { %v595_v4 = vadd.f32 %v659_v62, %v579_v2  ;;  %v688_v5 = vadd.f32 %v687_v3, %v686_v63 }
 0x26b   :  { %597 = vst [vmem:[%s994_s6] sm:$0xff] %v595_v4  ;;  %v580_v6 = vadd.f32 %v688_v5, %v819_v1 }
 0x26d   :  { %v596_v7 = vadd.f32 %v659_v62, %v580_v6 }
 0x26f   :  { %598 = vst [vmem:[%s994_s6 + $0x8] sm:$0xff] %v596_v7 }

</bundles_post_ra>
